<compile_context>
chip_gen: v7x
topology: tpu7x:2x2x1
jax: 0.10.0
libtpu: 0.0.40
codegen_flags: <defaults>
</compile_context>

<pallas_src>
import jax
import jax.numpy as jnp
import numpy as np
from jax.experimental import pallas as pl
from jax.experimental.pallas import tpu as pltpu

# ---- model hyper-params (small but consistent with the module) ----
HEADS = 2
DIM_HEAD = 128
INNER_DIM = HEADS * DIM_HEAD          # 256
HIDDEN = INNER_DIM * 4                # 1024
EPS = 1e-6
SCALE = DIM_HEAD ** (-0.5)

BATCH = 2
SEQ = 8


def _make_encoder_kernel(B, N):
    BN = B * N
    D = INNER_DIM
    dh = DIM_HEAD
    bf16 = jnp.bfloat16

    def encoder_kernel(x_ref, wqkv_ref, wout_ref, w1_ref, w2_ref, vecs_ref, o_ref):
        x = x_ref[...]                                   # (BN, D)  f32
        vecs = vecs_ref[...]                             # (8, D)   f32 packed vectors
        bout = vecs[0:1]
        g1, b1 = vecs[1:2], vecs[2:3]
        g2, b2 = vecs[3:4], vecs[4:5]

        # ---- fused QKV projection: bf16 x bf16 -> f32 accumulation ----
        # (attention scale dim_head**-0.5 already folded into the Q columns of W_qkv)
        qkv = jnp.dot(x.astype(bf16), wqkv_ref[...],
                      preferred_element_type=jnp.float32)        # (BN, 3D) f32

        # ---- stack heads head-major along a leading axis: index = h*B + b ----
        # Each per-head slice is a 128-lane-aligned column block; reshape/concat are
        # major-dim only (no XLU).
        def stack(off):
            return jnp.concatenate(
                [qkv[:, off + h * dh: off + (h + 1) * dh].reshape(B, N, dh)
                 for h in range(HEADS)], axis=0).astype(bf16)     # (H*B, N, dh)

        q = stack(0)
        k = stack(D)
        v = stack(2 * D)

        # ---- one batched attention over all (head, batch) pairs ----
        # transpose-free contraction on the MXU; softmax math in f32.
        s = jnp.einsum('bnd,bmd->bnm', q, k,
                       preferred_element_type=jnp.float32)        # (H*B, N, N)
        m = jnp.max(s, axis=-1, keepdims=True)
        p = jnp.exp(s - m)
        a = p * pl.reciprocal(jnp.sum(p, axis=-1, keepdims=True), approx=True)
        ctx = jnp.einsum('bnm,bmd->bnd', a.astype(bf16), v,
                         preferred_element_type=jnp.float32)      # (H*B, N, dh) f32

        # ---- lane-aligned head merge -> single K=256 output projection ----
        ctx2d = jnp.concatenate(
            [ctx[h * B:(h + 1) * B].reshape(BN, dh) for h in range(HEADS)],
            axis=-1)                                              # (BN, D)
        attn_out = jnp.dot(ctx2d.astype(bf16), wout_ref[...],
                           preferred_element_type=jnp.float32) + bout

        # ---- residual + LayerNorm 1 (one-pass variance, rsqrt on the EUP) ----
        h1 = x + attn_out
        mu1 = jnp.mean(h1, axis=-1, keepdims=True)
        var1 = jnp.mean(h1 * h1, axis=-1, keepdims=True) - mu1 * mu1
        h1n = (h1 - mu1) * jax.lax.rsqrt(var1 + EPS) * g1 + b1

        # ---- feed-forward (two bias-free linears, no activation between them) ----
        ff = jnp.dot(h1n.astype(bf16), w1_ref[...],
                     preferred_element_type=jnp.float32)          # (BN, 4D)
        ff = jnp.dot(ff.astype(bf16), w2_ref[...],
                     preferred_element_type=jnp.float32)          # (BN, D)

        # ---- residual + LayerNorm 2 ----
        h2 = h1n + ff
        mu2 = jnp.mean(h2, axis=-1, keepdims=True)
        var2 = jnp.mean(h2 * h2, axis=-1, keepdims=True) - mu2 * mu2
        o_ref[...] = ((h2 - mu2) * jax.lax.rsqrt(var2 + EPS) * g2
                      + b2).astype(o_ref.dtype)

    return encoder_kernel


def transformer_encoder(x, kernel_params):
    """x: (B, N, D).  kernel_params: (wqkv_bf16, wout_bf16, w1_bf16, w2_bf16, vecs_f32)
    with the attention scale pre-folded into the Q columns of wqkv."""
    B, N, D = x.shape
    assert D == INNER_DIM
    # Collapse batch into the MXU M-dimension; whole problem fits VMEM in one shot,
    # so no grid -> per-step overhead paid exactly once.
    x2 = x.reshape(B * N, D)

    vmem = pl.BlockSpec(memory_space=pltpu.MemorySpace.VMEM)

    out = pl.pallas_call(
        _make_encoder_kernel(B, N),
        out_shape=jax.ShapeDtypeStruct((B * N, D), x.dtype),
        in_specs=[vmem] * 6,
        out_specs=vmem,
    )(x2, *kernel_params)
    return out.reshape(B, N, D)


def pack_kernel_params(params):
    """Fold the attention scale into W_qkv's Q columns, cast the four weight matrices
    to bf16, and pack the five (1,256) vectors into one (8,256) f32 array."""
    (wqkv, wout, bout, g1, b1, w1, w2, g2, b2) = params
    wqkv_folded = wqkv.at[:, :INNER_DIM].multiply(SCALE)
    vecs = jnp.zeros((8, INNER_DIM), jnp.float32)
    vecs = (vecs.at[0].set(bout[0]).at[1].set(g1[0]).at[2].set(b1[0])
                .at[3].set(g2[0]).at[4].set(b2[0]))
    return (wqkv_folded.astype(jnp.bfloat16),
            wout.astype(jnp.bfloat16),
            w1.astype(jnp.bfloat16),
            w2.astype(jnp.bfloat16),
            vecs)


def reference(x, params):
    """Pure-JAX f32 reference mirroring the PyTorch forward (eval mode), using the
    unfolded f32 weights and an explicit attention scale."""
    (wqkv, wout, bout, g1, b1, w1, w2, g2, b2) = params
    B, N, D = x.shape
    qkv = x @ wqkv                                               # (B, N, 3D)
    q, k, v = jnp.split(qkv, 3, axis=-1)

    def split_heads(t):
        return t.reshape(B, N, HEADS, DIM_HEAD).transpose(0, 2, 1, 3)

    q, k, v = map(split_heads, (q, k, v))
    dots = jnp.einsum("bhnd,bhmd->bhnm", q, k) * SCALE
    attn = jax.nn.softmax(dots, axis=-1)
    out = jnp.einsum("bhnm,bhmd->bhnd", attn, v)
    out = out.transpose(0, 2, 1, 3).reshape(B, N, D)
    out = out @ wout + bout

    def ln(t, g, bta):
        mu = t.mean(-1, keepdims=True)
        var = ((t - mu) ** 2).mean(-1, keepdims=True)
        return (t - mu) / jnp.sqrt(var + EPS) * g + bta

    h1 = ln(x + out, g1, b1)
    ff = (h1 @ w1) @ w2
    return ln(h1 + ff, g2, b2)


def init_params(key):
    ks = jax.random.split(key, 9)
    scale = 0.02
    wqkv = scale * jax.random.normal(ks[0], (INNER_DIM, 3 * INNER_DIM), jnp.float32)
    wout = scale * jax.random.normal(ks[1], (INNER_DIM, INNER_DIM), jnp.float32)
    bout = scale * jax.random.normal(ks[2], (1, INNER_DIM), jnp.float32)
    g1 = jnp.ones((1, INNER_DIM), jnp.float32) + scale * jax.random.normal(ks[3], (1, INNER_DIM))
    b1 = scale * jax.random.normal(ks[4], (1, INNER_DIM), jnp.float32)
    w1 = scale * jax.random.normal(ks[5], (INNER_DIM, HIDDEN), jnp.float32)
    w2 = scale * jax.random.normal(ks[6], (HIDDEN, INNER_DIM), jnp.float32)
    g2 = jnp.ones((1, INNER_DIM), jnp.float32) + scale * jax.random.normal(ks[7], (1, INNER_DIM))
    b2 = scale * jax.random.normal(ks[8], (1, INNER_DIM), jnp.float32)
    return (wqkv, wout, bout, g1, b1, w1, w2, g2, b2)


if __name__ == "__main__":
    key = jax.random.PRNGKey(0)
    kx, kp = jax.random.split(key)
    x = jax.random.normal(kx, (BATCH, SEQ, INNER_DIM), jnp.float32)
    params = init_params(kp)
    kernel_params = pack_kernel_params(params)

    out = jax.block_until_ready(transformer_encoder(x, kernel_params))

    # Tolerance widened from 1e-4 to the bf16-weight quantization budget (review item:
    # "validate or adjust tolerance"): bf16 rel. eps ~ 8e-3 through five matmuls, with
    # LayerNorms keeping the error O(bf16 eps) on O(1) outputs.
    ref = jax.block_until_ready(reference(x, params))
    np.testing.assert_allclose(np.asarray(out), np.asarray(ref), rtol=2e-2, atol=2e-2)

    print("KERNEL_OK")
</pallas_src>

<mosaic_0001>
module attributes {stable_mosaic.version = 11 : i64} {
  func.func @encoder_kernel(%arg0: memref<16x256xf32, #tpu.memory_space<vmem>>, %arg1: memref<256x768xbf16, #tpu.memory_space<vmem>>, %arg2: memref<256x256xbf16, #tpu.memory_space<vmem>>, %arg3: memref<256x1024xbf16, #tpu.memory_space<vmem>>, %arg4: memref<1024x256xbf16, #tpu.memory_space<vmem>>, %arg5: memref<8x256xf32, #tpu.memory_space<vmem>>, %arg6: memref<16x256xf32, #tpu.memory_space<vmem>>) attributes {dimension_semantics = [], scalar_prefetch = 0 : i64, scratch_operands = 0 : i64, tpu.core_type = #tpu.core_type<tc>} {
    %c0 = arith.constant 0 : index
    %c0_0 = arith.constant 0 : index
    %0 = vector.load %arg0[%c0, %c0_0] : memref<16x256xf32, #tpu.memory_space<vmem>>, vector<16x256xf32>
    %c0_1 = arith.constant 0 : index
    %c0_2 = arith.constant 0 : index
    %1 = vector.load %arg5[%c0_1, %c0_2] : memref<8x256xf32, #tpu.memory_space<vmem>>, vector<8x256xf32>
    %2 = vector.extract_strided_slice %1 {offsets = [0, 0], sizes = [1, 256], strides = [1, 1]} : vector<8x256xf32> to vector<1x256xf32>
    %3 = vector.extract_strided_slice %1 {offsets = [1, 0], sizes = [1, 256], strides = [1, 1]} : vector<8x256xf32> to vector<1x256xf32>
    %4 = vector.extract_strided_slice %1 {offsets = [2, 0], sizes = [1, 256], strides = [1, 1]} : vector<8x256xf32> to vector<1x256xf32>
    %5 = vector.extract_strided_slice %1 {offsets = [3, 0], sizes = [1, 256], strides = [1, 1]} : vector<8x256xf32> to vector<1x256xf32>
    %6 = vector.extract_strided_slice %1 {offsets = [4, 0], sizes = [1, 256], strides = [1, 1]} : vector<8x256xf32> to vector<1x256xf32>
    %7 = arith.truncf %0 : vector<16x256xf32> to vector<16x256xbf16>
    %c0_3 = arith.constant 0 : index
    %c0_4 = arith.constant 0 : index
    %8 = vector.load %arg1[%c0_3, %c0_4] : memref<256x768xbf16, #tpu.memory_space<vmem>>, vector<256x768xbf16>
    %cst = arith.constant dense<0.000000e+00> : vector<16x768xf32>
    %9 = tpu.matmul %7, %8, %cst {dimension_numbers = #tpu.dot_dimension_numbers<[1], [0], [0], [1], [0, 0, 1, 1], [], []>} : vector<16x256xbf16>, vector<256x768xbf16>, vector<16x768xf32> -> vector<16x768xf32>
    %10 = vector.extract_strided_slice %9 {offsets = [0, 0], sizes = [16, 128], strides = [1, 1]} : vector<16x768xf32> to vector<16x128xf32>
    %11 = vector.shape_cast %10 : vector<16x128xf32> to vector<2x8x128xf32>
    %12 = vector.extract_strided_slice %9 {offsets = [0, 128], sizes = [16, 128], strides = [1, 1]} : vector<16x768xf32> to vector<16x128xf32>
    %13 = vector.shape_cast %12 : vector<16x128xf32> to vector<2x8x128xf32>
    %14 = tpu.concatenate %11, %13 in 0 : vector<2x8x128xf32>, vector<2x8x128xf32> -> vector<4x8x128xf32>
    %15 = arith.truncf %14 : vector<4x8x128xf32> to vector<4x8x128xbf16>
    %16 = vector.extract_strided_slice %9 {offsets = [0, 256], sizes = [16, 128], strides = [1, 1]} : vector<16x768xf32> to vector<16x128xf32>
    %17 = vector.shape_cast %16 : vector<16x128xf32> to vector<2x8x128xf32>
    %18 = vector.extract_strided_slice %9 {offsets = [0, 384], sizes = [16, 128], strides = [1, 1]} : vector<16x768xf32> to vector<16x128xf32>
    %19 = vector.shape_cast %18 : vector<16x128xf32> to vector<2x8x128xf32>
    %20 = tpu.concatenate %17, %19 in 0 : vector<2x8x128xf32>, vector<2x8x128xf32> -> vector<4x8x128xf32>
    %21 = arith.truncf %20 : vector<4x8x128xf32> to vector<4x8x128xbf16>
    %22 = vector.extract_strided_slice %9 {offsets = [0, 512], sizes = [16, 128], strides = [1, 1]} : vector<16x768xf32> to vector<16x128xf32>
    %23 = vector.shape_cast %22 : vector<16x128xf32> to vector<2x8x128xf32>
    %24 = vector.extract_strided_slice %9 {offsets = [0, 640], sizes = [16, 128], strides = [1, 1]} : vector<16x768xf32> to vector<16x128xf32>
    %25 = vector.shape_cast %24 : vector<16x128xf32> to vector<2x8x128xf32>
    %26 = tpu.concatenate %23, %25 in 0 : vector<2x8x128xf32>, vector<2x8x128xf32> -> vector<4x8x128xf32>
    %27 = arith.truncf %26 : vector<4x8x128xf32> to vector<4x8x128xbf16>
    "tpu.trace_start"() <{level = 10 : i32, message = "bnd,bmd->bnm"}> : () -> ()
    %cst_5 = arith.constant dense<0.000000e+00> : vector<4x8x8xf32>
    %28 = tpu.matmul %15, %21, %cst_5 {dimension_numbers = #tpu.dot_dimension_numbers<[2], [2], [1], [1], [0, 0, 0, 1, 1, 1], [0], [0]>} : vector<4x8x128xbf16>, vector<4x8x128xbf16>, vector<4x8x8xf32> -> vector<4x8x8xf32>
    "tpu.trace_stop"() : () -> ()
    %cst_6 = arith.constant dense<0xFF800000> : vector<4x8xf32>
    %29 = vector.multi_reduction <maximumf>, %28, %cst_6 [2] : vector<4x8x8xf32> to vector<4x8xf32>
    %30 = vector.shape_cast %29 : vector<4x8xf32> to vector<4x8x1xf32>
    %31 = vector.broadcast %30 : vector<4x8x1xf32> to vector<4x8x8xf32>
    %32 = arith.subf %28, %31 : vector<4x8x8xf32>
    %33 = math.exp %32 : vector<4x8x8xf32>
    %cst_7 = arith.constant dense<0.000000e+00> : vector<4x8xf32>
    %34 = vector.multi_reduction <add>, %33, %cst_7 [2] : vector<4x8x8xf32> to vector<4x8xf32>
    %35 = vector.shape_cast %34 : vector<4x8xf32> to vector<4x8x1xf32>
    %36 = tpu.reciprocal %35 {approx = true} : vector<4x8x1xf32> -> vector<4x8x1xf32>
    %37 = vector.broadcast %36 : vector<4x8x1xf32> to vector<4x8x8xf32>
    %38 = arith.mulf %33, %37 : vector<4x8x8xf32>
    %39 = arith.truncf %38 : vector<4x8x8xf32> to vector<4x8x8xbf16>
    "tpu.trace_start"() <{level = 10 : i32, message = "bnm,bmd->bnd"}> : () -> ()
    %cst_8 = arith.constant dense<0.000000e+00> : vector<4x8x128xf32>
    %40 = tpu.matmul %39, %27, %cst_8 {dimension_numbers = #tpu.dot_dimension_numbers<[2], [1], [1], [2], [0, 0, 0, 1, 1, 2], [0], [0]>} : vector<4x8x8xbf16>, vector<4x8x128xbf16>, vector<4x8x128xf32> -> vector<4x8x128xf32>
    "tpu.trace_stop"() : () -> ()
    %41 = vector.extract_strided_slice %40 {offsets = [0, 0, 0], sizes = [2, 8, 128], strides = [1, 1, 1]} : vector<4x8x128xf32> to vector<2x8x128xf32>
    %42 = vector.shape_cast %41 : vector<2x8x128xf32> to vector<16x128xf32>
    %43 = vector.extract_strided_slice %40 {offsets = [2, 0, 0], sizes = [2, 8, 128], strides = [1, 1, 1]} : vector<4x8x128xf32> to vector<2x8x128xf32>
    %44 = vector.shape_cast %43 : vector<2x8x128xf32> to vector<16x128xf32>
    %45 = tpu.concatenate %42, %44 in 1 : vector<16x128xf32>, vector<16x128xf32> -> vector<16x256xf32>
    %46 = arith.truncf %45 : vector<16x256xf32> to vector<16x256xbf16>
    %c0_9 = arith.constant 0 : index
    %c0_10 = arith.constant 0 : index
    %47 = vector.load %arg2[%c0_9, %c0_10] : memref<256x256xbf16, #tpu.memory_space<vmem>>, vector<256x256xbf16>
    %cst_11 = arith.constant dense<0.000000e+00> : vector<16x256xf32>
    %48 = tpu.matmul %46, %47, %cst_11 {dimension_numbers = #tpu.dot_dimension_numbers<[1], [0], [0], [1], [0, 0, 1, 1], [], []>} : vector<16x256xbf16>, vector<256x256xbf16>, vector<16x256xf32> -> vector<16x256xf32>
    %49 = vector.broadcast %2 : vector<1x256xf32> to vector<16x256xf32>
    %50 = arith.addf %48, %49 : vector<16x256xf32>
    %51 = arith.addf %0, %50 : vector<16x256xf32>
    %cst_12 = arith.constant dense<0.000000e+00> : vector<16xf32>
    %52 = vector.multi_reduction <add>, %51, %cst_12 [1] : vector<16x256xf32> to vector<16xf32>
    %53 = vector.shape_cast %52 : vector<16xf32> to vector<16x1xf32>
    %cst_13 = arith.constant 2.560000e+02 : f32
    %54 = vector.broadcast %cst_13 : f32 to vector<16x1xf32>
    %55 = arith.divf %53, %54 : vector<16x1xf32>
    %56 = arith.mulf %51, %51 : vector<16x256xf32>
    %cst_14 = arith.constant dense<0.000000e+00> : vector<16xf32>
    %57 = vector.multi_reduction <add>, %56, %cst_14 [1] : vector<16x256xf32> to vector<16xf32>
    %58 = vector.shape_cast %57 : vector<16xf32> to vector<16x1xf32>
    %cst_15 = arith.constant 2.560000e+02 : f32
    %59 = vector.broadcast %cst_15 : f32 to vector<16x1xf32>
    %60 = arith.divf %58, %59 : vector<16x1xf32>
    %61 = arith.mulf %55, %55 : vector<16x1xf32>
    %62 = arith.subf %60, %61 : vector<16x1xf32>
    %63 = vector.broadcast %55 : vector<16x1xf32> to vector<16x256xf32>
    %64 = arith.subf %51, %63 : vector<16x256xf32>
    %cst_16 = arith.constant 9.99999997E-7 : f32
    %65 = vector.broadcast %cst_16 : f32 to vector<16x1xf32>
    %66 = arith.addf %62, %65 : vector<16x1xf32>
    %67 = math.rsqrt %66 : vector<16x1xf32>
    %68 = vector.broadcast %67 : vector<16x1xf32> to vector<16x256xf32>
    %69 = arith.mulf %64, %68 : vector<16x256xf32>
    %70 = vector.broadcast %3 : vector<1x256xf32> to vector<16x256xf32>
    %71 = arith.mulf %69, %70 : vector<16x256xf32>
    %72 = vector.broadcast %4 : vector<1x256xf32> to vector<16x256xf32>
    %73 = arith.addf %71, %72 : vector<16x256xf32>
    %74 = arith.truncf %73 : vector<16x256xf32> to vector<16x256xbf16>
    %c0_17 = arith.constant 0 : index
    %c0_18 = arith.constant 0 : index
    %75 = vector.load %arg3[%c0_17, %c0_18] : memref<256x1024xbf16, #tpu.memory_space<vmem>>, vector<256x1024xbf16>
    %cst_19 = arith.constant dense<0.000000e+00> : vector<16x1024xf32>
    %76 = tpu.matmul %74, %75, %cst_19 {dimension_numbers = #tpu.dot_dimension_numbers<[1], [0], [0], [1], [0, 0, 1, 1], [], []>} : vector<16x256xbf16>, vector<256x1024xbf16>, vector<16x1024xf32> -> vector<16x1024xf32>
    %77 = arith.truncf %76 : vector<16x1024xf32> to vector<16x1024xbf16>
    %c0_20 = arith.constant 0 : index
    %c0_21 = arith.constant 0 : index
    %78 = vector.load %arg4[%c0_20, %c0_21] : memref<1024x256xbf16, #tpu.memory_space<vmem>>, vector<1024x256xbf16>
    %cst_22 = arith.constant dense<0.000000e+00> : vector<16x256xf32>
    %79 = tpu.matmul %77, %78, %cst_22 {dimension_numbers = #tpu.dot_dimension_numbers<[1], [0], [0], [1], [0, 0, 1, 1], [], []>} : vector<16x1024xbf16>, vector<1024x256xbf16>, vector<16x256xf32> -> vector<16x256xf32>
    %80 = arith.addf %73, %79 : vector<16x256xf32>
    %cst_23 = arith.constant dense<0.000000e+00> : vector<16xf32>
    %81 = vector.multi_reduction <add>, %80, %cst_23 [1] : vector<16x256xf32> to vector<16xf32>
    %82 = vector.shape_cast %81 : vector<16xf32> to vector<16x1xf32>
    %cst_24 = arith.constant 2.560000e+02 : f32
    %83 = vector.broadcast %cst_24 : f32 to vector<16x1xf32>
    %84 = arith.divf %82, %83 : vector<16x1xf32>
    %85 = arith.mulf %80, %80 : vector<16x256xf32>
    %cst_25 = arith.constant dense<0.000000e+00> : vector<16xf32>
    %86 = vector.multi_reduction <add>, %85, %cst_25 [1] : vector<16x256xf32> to vector<16xf32>
    %87 = vector.shape_cast %86 : vector<16xf32> to vector<16x1xf32>
    %cst_26 = arith.constant 2.560000e+02 : f32
    %88 = vector.broadcast %cst_26 : f32 to vector<16x1xf32>
    %89 = arith.divf %87, %88 : vector<16x1xf32>
    %90 = arith.mulf %84, %84 : vector<16x1xf32>
    %91 = arith.subf %89, %90 : vector<16x1xf32>
    %92 = vector.broadcast %84 : vector<16x1xf32> to vector<16x256xf32>
    %93 = arith.subf %80, %92 : vector<16x256xf32>
    %cst_27 = arith.constant 9.99999997E-7 : f32
    %94 = vector.broadcast %cst_27 : f32 to vector<16x1xf32>
    %95 = arith.addf %91, %94 : vector<16x1xf32>
    %96 = math.rsqrt %95 : vector<16x1xf32>
    %97 = vector.broadcast %96 : vector<16x1xf32> to vector<16x256xf32>
    %98 = arith.mulf %93, %97 : vector<16x256xf32>
    %99 = vector.broadcast %5 : vector<1x256xf32> to vector<16x256xf32>
    %100 = arith.mulf %98, %99 : vector<16x256xf32>
    %101 = vector.broadcast %6 : vector<1x256xf32> to vector<16x256xf32>
    %102 = arith.addf %100, %101 : vector<16x256xf32>
    %c0_28 = arith.constant 0 : index
    %c0_29 = arith.constant 0 : index
    %103 = vector.load %arg6[%c0_28, %c0_29] : memref<16x256xf32, #tpu.memory_space<vmem>>, vector<16x256xf32>
    tpu.vector_store %arg6[%c0_28, %c0_29], %102 {strides = array<i32>} : memref<16x256xf32, #tpu.memory_space<vmem>>, vector<16x256xf32>,
    return
  }
}

</mosaic_0001>

<bundles_post_ra>
// kernel: tpu_custom_call.1
= control target key start
LH: loop header
LB: loop body
LE: loop exit
PB: predicated region body
PF: predicated region fallthrough
CT: control target
= control target key end

     0   :  { %11 = vsyncpa [#allocation3], 0  ;;  %s4856_s0 = inlined_call_operand.hbm [shape: f32[16,256], index: 0, kind: input, shape index: {}]   ;;  %s4857_s1 = inlined_call_operand.hbm [shape: bf16[256,768], index: 1, kind: input, shape index: {}]   ;;  %s4858_s2 = inlined_call_operand.hbm [shape: bf16[256,256], index: 2, kind: input, shape index: {}]   ;;  %s4859_s3 = inlined_call_operand.hbm [shape: bf16[256,1024], index: 3, kind: input, shape index: {}]   ;;  %s4860_s4 = inlined_call_operand.hbm [shape: bf16[1024,256], index: 4, kind: input, shape index: {}]   ;;  %s4861_s5 = inlined_call_operand.vmem [shape: f32[8,256], index: 5, kind: input, shape index: {}]   ;;  %s4862_s6 = inlined_call_operand.hbm [shape: f32[16,256], index: 6, kind: output, shape index: {}]  }
   0x1   :  { %12 = vsyncpa [#allocation6], 0 }
   0x2   :  { %13 = vsyncpa [#allocation9], 0 }
   0x3   :  { %14 = vsyncpa [#allocation4], 0  ;;  %s4533_s21 = smov [#allocation5]   ;;  %s4393_s25 = scalar_lea.hbm %s4857_s1, 12288 }
   0x4   :  { %s32_s22 = sshll.u32 %s4533_s21, 4  ;;  %p4394_p0 = scmp.ne.s32.totalorder %s4857_s1, %s4393_s25  ;;  %s33_s22 = int_to_ptr.vmem [resolvable:$true] %s32_s22 }
   0x5   :  { %p4397_p1 = scmp.lt.u32.totalorder %s4393_s25, %s4857_s1 }
   0x7   :  { %p4399_p2 = pnand %p4397_p1, %p4394_p0 }
   0x9   :  { %4402 = shalt.err (!%p4399_p2)
}
   0xa   :  { %s4403_s30 = scalar_lea.vmem %s33_s22, 12288  ;;  %p4408_p4 = scmp.lt.s32.totalorder %s33_s22, %s33_s22 }
   0xb   :  { %p4404_p3 = scmp.ne.s32.totalorder %s33_s22, %s4403_s30  ;;  %p4409_p5 = scmp.lt.s32.totalorder %s4403_s30, %s4403_s30 }
   0xd   :  { %p4410_p6 = por %p4409_p5, %p4408_p4 }
   0xf   :  { %p4411_p7 = pnand %p4410_p6, %p4404_p3 }
  0x11   :  { %4414 = shalt.err (!%p4411_p7)
}
  0x12   :  { %s4534_s7 = smov 384   ;;  %s4535_s8 = smov 24  }
  0x13   :  { %38 = dma.hbm_to_vmem [thread:$0]  %s4857_s1, 12288, %s33_s22, [#allocation6], %s4534_s7, %s4534_s7, %s4535_s8  }
  0x14   :  { %s4536_s11 = smov [#allocation8]   ;;  %s4415_s15 = scalar_lea.hbm %s4859_s3, 16384 }
  0x15   :  { %s56_s12 = sshll.u32 %s4536_s11, 4  ;;  %p4416_p8 = scmp.ne.s32.totalorder %s4859_s3, %s4415_s15  ;;  %s57_s12 = int_to_ptr.vmem [resolvable:$true] %s56_s12 }
  0x16   :  { %p4419_p9 = scmp.lt.u32.totalorder %s4415_s15, %s4859_s3 }
  0x18   :  { %p4421_p10 = pnand %p4419_p9, %p4416_p8 }
  0x1a   :  { %4424 = shalt.err (!%p4421_p10)
}
  0x1b   :  { %s4425_s20 = scalar_lea.vmem %s57_s12, 16384  ;;  %p4430_p12 = scmp.lt.s32.totalorder %s57_s12, %s57_s12 }
  0x1c   :  { %p4426_p11 = scmp.ne.s32.totalorder %s57_s12, %s4425_s20  ;;  %p4431_p13 = scmp.lt.s32.totalorder %s4425_s20, %s4425_s20 }
  0x1e   :  { %p4432_p0 = por %p4431_p13, %p4430_p12 }
  0x20   :  { %p4433_p1 = pnand %p4432_p0, %p4426_p11 }
  0x22   :  { %4436 = shalt.err (!%p4433_p1)
}
  0x23   :  { %s4537_s1 = smov 512   ;;  %s4538_s21 = smov 32  }
  0x24   :  { %62 = dma.hbm_to_vmem [thread:$0]  %s4859_s3, 16384, %s57_s12, [#allocation9], %s4537_s1, %s4537_s1, %s4538_s21  }
  0x25   :  { %s4539_s24 = smov [#allocation2]   ;;  %s4437_s28 = scalar_lea.hbm %s4856_s0, 512 }
  0x26   :  { %s20_s25 = sshll.u32 %s4539_s24, 4  ;;  %p4438_p2 = scmp.ne.s32.totalorder %s4856_s0, %s4437_s28  ;;  %s21_s25 = int_to_ptr.vmem [resolvable:$true] %s20_s25 }
  0x27   :  { %p4441_p3 = scmp.lt.u32.totalorder %s4437_s28, %s4856_s0 }
  0x29   :  { %p4443_p4 = pnand %p4441_p3, %p4438_p2 }
  0x2b   :  { %4446 = shalt.err (!%p4443_p4)
}
  0x2c   :  { %s4447_s9 = scalar_lea.vmem %s21_s25, 512  ;;  %p4452_p6 = scmp.lt.s32.totalorder %s21_s25, %s21_s25 }
  0x2d   :  { %p4448_p5 = scmp.ne.s32.totalorder %s21_s25, %s4447_s9  ;;  %p4453_p7 = scmp.lt.s32.totalorder %s4447_s9, %s4447_s9 }
  0x2f   :  { %p4454_p8 = por %p4453_p7, %p4452_p6 }
  0x31   :  { %p4455_p9 = pnand %p4454_p8, %p4448_p5 }
  0x33   :  { %4458 = shalt.err (!%p4455_p9)
}
  0x34   :  { %s4540_s3 = smov 256   ;;  %s4541_s10 = smov 16  }
  0x35   :  { %26 = dma.hbm_to_vmem [thread:$0]  %s4856_s0, 512, %s21_s25, [#allocation3], %s4540_s3, %s4540_s3, %s4541_s10  }
  0x36   :  { %s4542_s13 = smov [#allocation7]   ;;  %s4459_s17 = scalar_lea.hbm %s4858_s2, 4096 }
  0x37   :  { %s44_s14 = sshll.u32 %s4542_s13, 4  ;;  %p4460_p10 = scmp.ne.s32.totalorder %s4858_s2, %s4459_s17  ;;  %s45_s14 = int_to_ptr.vmem [resolvable:$true] %s44_s14 }
  0x38   :  { %p4463_p11 = scmp.lt.u32.totalorder %s4459_s17, %s4858_s2 }
  0x3a   :  { %p4465_p12 = pnand %p4463_p11, %p4460_p10 }
  0x3c   :  { %4468 = shalt.err (!%p4465_p12)
}
  0x3d   :  { %s4469_s21 = scalar_lea.vmem %s45_s14, 4096  ;;  %p4474_p0 = scmp.lt.s32.totalorder %s45_s14, %s45_s14 }
  0x3e   :  { %p4470_p13 = scmp.ne.s32.totalorder %s45_s14, %s4469_s21  ;;  %p4475_p1 = scmp.lt.s32.totalorder %s4469_s21, %s4469_s21 }
  0x40   :  { %p4476_p2 = por %p4475_p1, %p4474_p0 }
  0x42   :  { %p4477_p3 = pnand %p4476_p2, %p4470_p13 }
  0x44   :  { %4480 = shalt.err (!%p4477_p3)
}
  0x45   :  { %s4543_s0 = smov 128   ;;  %s4544_s22 = smov 8  }
  0x46   :  { %50 = dma.hbm_to_vmem [thread:$0]  %s4858_s2, 4096, %s45_s14, [#allocation6], %s4543_s0, %s4543_s0, %s4544_s22  }
  0x47   :  { %s4545_s25 = smov [#allocation10]   ;;  %s4481_s29 = scalar_lea.hbm %s4860_s4, 16384 }
  0x48   :  { %s68_s26 = sshll.u32 %s4545_s25, 4  ;;  %p4482_p4 = scmp.ne.s32.totalorder %s4860_s4, %s4481_s29  ;;  %s69_s26 = int_to_ptr.vmem [resolvable:$true] %s68_s26 }
  0x49   :  { %p4485_p5 = scmp.lt.u32.totalorder %s4481_s29, %s4860_s4 }
  0x4b   :  { %p4487_p6 = pnand %p4485_p5, %p4482_p4 }
  0x4d   :  { %4490 = shalt.err (!%p4487_p6)
}
  0x4e   :  { %s4491_s11 = scalar_lea.vmem %s69_s26, 16384  ;;  %p4496_p8 = scmp.lt.s32.totalorder %s69_s26, %s69_s26 }
  0x4f   :  { %p4492_p7 = scmp.ne.s32.totalorder %s69_s26, %s4491_s11  ;;  %p4497_p9 = scmp.lt.s32.totalorder %s4491_s11, %s4491_s11 }
  0x51   :  { %p4498_p10 = por %p4497_p9, %p4496_p8 }
  0x53   :  { %p4499_p11 = pnand %p4498_p10, %p4492_p7 }
  0x55   :  { %4502 = shalt.err (!%p4499_p11)
}
  0x56   :  { %74 = dma.hbm_to_vmem [thread:$0]  %s4860_s4, 16384, %s69_s26, [#allocation9], %s4543_s0, %s4543_s0, %s4544_s22  }
  0x57   :  { %4525 = dma.done.wait [#allocation3], 512  }
  0x58   :  { %4526 = vsyncadd [#allocation3], 4294966784 }
  0x59   :  { %4527 = dma.done.wait [#allocation6], 16384  }
  0x5a   :  { %4528 = vsyncadd [#allocation6], 4294950912 }
  0x5b   :  { %4529 = dma.done.wait [#allocation9], 32768  }
  0x5c   :  { %4530 = vsyncadd [#allocation9], 4294934528  ;;  %v3979_v0 = vld [vmem:[#allocation5 + $0x4] ss:$24 sps:$4 sm:$0xff]   ;;  %v3981_v1 = vld [vmem:[#allocation5] ss:$24 sps:$4 sm:$0xff]  }
  0x5d   :  { %677 = vmatprep.subr.bf16.mxu0 %v3979_v0  ;;  %v3982_v2 = vld [vmem:[#allocation5 + $0x34] ss:$24 sps:$4 sm:$0xff]   ;;  %v3984_v3 = vld [vmem:[#allocation5 + $0x30] ss:$24 sps:$4 sm:$0xff]   ;;  %v3985_v4 = vld [vmem:[#allocation5 + $0x64] ss:$24 sps:$4 sm:$0xff]  }
  0x5e   :  { %678 = vmatpush1.bf16.msra.mxu0 %v3981_v1  ;;  %v3987_v5 = vld [vmem:[#allocation5 + $0x60] ss:$24 sps:$4 sm:$0xff]   ;;  %v3988_v6 = vld [vmem:[#allocation5 + $0x94] ss:$24 sps:$4 sm:$0xff]   ;;  %v3990_v7 = vld [vmem:[#allocation5 + $0x90] ss:$24 sps:$4 sm:$0xff]  }
  0x5f   :  { %679 = vmatprep.subr.bf16.mxu0 %v3982_v2  ;;  %v3991_v8 = vld [vmem:[#allocation5 + $0xc4] ss:$24 sps:$4 sm:$0xff]   ;;  %v3993_v9 = vld [vmem:[#allocation5 + $0xc0] ss:$24 sps:$4 sm:$0xff]   ;;  %v3994_v10 = vld [vmem:[#allocation5 + $0xf4] ss:$24 sps:$4 sm:$0xff]  }
  0x60   :  { %v3996_v11 = vld [vmem:[#allocation5 + $0xf0] ss:$24 sps:$4 sm:$0xff]   ;;  %v3997_v12 = vld [vmem:[#allocation5 + $0x124] ss:$24 sps:$4 sm:$0xff]   ;;  %v3999_v16 = vld [vmem:[#allocation5 + $0x120] ss:$24 sps:$4 sm:$0xff]  }
  0x61   :  { %v94_v13 = vld [vmem:[#allocation2 + $0x8] sm:$0xff]  ;;  %v96_v14 = vld [vmem:[#allocation2 + $0x18] sm:$0xff]  ;;  %v93_v35 = vld [vmem:[#allocation2] sm:$0xff]  ;;  %vm4547_vm0 = vmmov 0   ;;  %vm1030_vm1 = vcmask 1043456   ;;  %vm978_vm2 = vcmask 64512  }
  0x62   :  { %680 = vmatpush1.bf16.msra.mxu0 %v3984_v3  ;;  %v4647_v15 = vpack.c.bf16 %v96_v14, %v94_v13  ;;  %v4000_v17 = vld [vmem:[#allocation5 + $0x154] ss:$24 sps:$4 sm:$0xff]   ;;  %v4002_v18 = vld [vmem:[#allocation5 + $0x150] ss:$24 sps:$4 sm:$0xff]   ;;  %v4003_v19 = vld [vmem:[#allocation5 + $0x184] ss:$24 sps:$4 sm:$0xff]  }
  0x63   :  { %681 = vmatprep.subr.bf16.mxu0 %v3985_v4  ;;  %v4005_v20 = vld [vmem:[#allocation5 + $0x180] ss:$24 sps:$4 sm:$0xff]   ;;  %v4006_v21 = vld [vmem:[#allocation5 + $0x1b4] ss:$24 sps:$4 sm:$0xff]   ;;  %v4008_v22 = vld [vmem:[#allocation5 + $0x1b0] ss:$24 sps:$4 sm:$0xff]  }
  0x64   :  { %709 = vmatprep.mubr.bf16.mxu0 %v4647_v15  ;;  %v4009_v23 = vld [vmem:[#allocation5 + $0x1e4] ss:$24 sps:$4 sm:$0xff]   ;;  %v4011_v24 = vld [vmem:[#allocation5 + $0x1e0] ss:$24 sps:$4 sm:$0xff]   ;;  %v4012_v25 = vld [vmem:[#allocation5 + $0x214] ss:$24 sps:$4 sm:$0xff]  }
  0x65   :  { %v4014_v26 = vld [vmem:[#allocation5 + $0x210] ss:$24 sps:$4 sm:$0xff]   ;;  %v4015_v27 = vld [vmem:[#allocation5 + $0x244] ss:$24 sps:$4 sm:$0xff]   ;;  %v4017_v28 = vld [vmem:[#allocation5 + $0x240] ss:$24 sps:$4 sm:$0xff]  }
  0x66   :  { %682 = vmatpush1.bf16.msra.mxu0 %v3987_v5  ;;  %v4018_v29 = vld [vmem:[#allocation5 + $0x274] ss:$24 sps:$4 sm:$0xff]   ;;  %v4020_v30 = vld [vmem:[#allocation5 + $0x270] ss:$24 sps:$4 sm:$0xff]   ;;  %v4021_v31 = vld [vmem:[#allocation5 + $0x2a4] ss:$24 sps:$4 sm:$0xff]  }
  0x67   :  { %683 = vmatprep.subr.bf16.mxu0 %v3988_v6  ;;  %v4023_v32 = vld [vmem:[#allocation5 + $0x2a0] ss:$24 sps:$4 sm:$0xff]   ;;  %v4024_v33 = vld [vmem:[#allocation5 + $0x2d4] ss:$24 sps:$4 sm:$0xff]   ;;  %v4026_v34 = vld [vmem:[#allocation5 + $0x2d0] ss:$24 sps:$4 sm:$0xff]  }
  0x68   :  { %v95_v36 = vld [vmem:[#allocation2 + $0x10] sm:$0xff]  ;;  %v4029_v37 = vld [vmem:[#allocation5 + $0xc] ss:$24 sps:$4 sm:$0xff]   ;;  %v4027_v38 = vld [vmem:[#allocation5 + $0x8] ss:$24 sps:$4 sm:$0xff]   ;;  %s4548_s20 = smov [#allocation11]  }
  0x69   :  { %v4650_v39 = vpack.c.bf16 %v95_v36, %v93_v35  ;;  %v4032_v40 = vld [vmem:[#allocation5 + $0x3c] ss:$24 sps:$4 sm:$0xff]   ;;  %v4030_v41 = vld [vmem:[#allocation5 + $0x38] ss:$24 sps:$4 sm:$0xff]   ;;  %v4035_v42 = vld [vmem:[#allocation5 + $0x6c] ss:$24 sps:$4 sm:$0xff]  }
  0x6a   :  { %684 = vmatpush1.bf16.msra.mxu0 %v3990_v7  ;;  %v4033_v43 = vld [vmem:[#allocation5 + $0x68] ss:$24 sps:$4 sm:$0xff]   ;;  %v4038_v44 = vld [vmem:[#allocation5 + $0x9c] ss:$24 sps:$4 sm:$0xff]   ;;  %v4036_v45 = vld [vmem:[#allocation5 + $0x98] ss:$24 sps:$4 sm:$0xff]  }
  0x6b   :  { %685 = vmatprep.subr.bf16.mxu0 %v3991_v8  ;;  %v4041_v46 = vld [vmem:[#allocation5 + $0xcc] ss:$24 sps:$4 sm:$0xff]   ;;  %v4039_v47 = vld [vmem:[#allocation5 + $0xc8] ss:$24 sps:$4 sm:$0xff]   ;;  %v4044_v48 = vld [vmem:[#allocation5 + $0xfc] ss:$24 sps:$4 sm:$0xff]  }
  0x6c   :  { %v4042_v49 = vld [vmem:[#allocation5 + $0xf8] ss:$24 sps:$4 sm:$0xff]   ;;  %v4047_v50 = vld [vmem:[#allocation5 + $0x12c] ss:$24 sps:$4 sm:$0xff]   ;;  %v4045_v51 = vld [vmem:[#allocation5 + $0x128] ss:$24 sps:$4 sm:$0xff]  }
  0x6d   :  { %v4050_v52 = vld [vmem:[#allocation5 + $0x15c] ss:$24 sps:$4 sm:$0xff]   ;;  %v4048_v53 = vld [vmem:[#allocation5 + $0x158] ss:$24 sps:$4 sm:$0xff]   ;;  %v4053_v54 = vld [vmem:[#allocation5 + $0x18c] ss:$24 sps:$4 sm:$0xff]  }
  0x6e   :  { %686 = vmatpush1.bf16.msra.mxu0 %v3993_v9  ;;  %v4051_v55 = vld [vmem:[#allocation5 + $0x188] ss:$24 sps:$4 sm:$0xff]   ;;  %v4056_v56 = vld [vmem:[#allocation5 + $0x1bc] ss:$24 sps:$4 sm:$0xff]   ;;  %v4054_v57 = vld [vmem:[#allocation5 + $0x1b8] ss:$24 sps:$4 sm:$0xff]  }
  0x6f   :  { %687 = vmatprep.subr.bf16.mxu0 %v3994_v10  ;;  %v4059_v58 = vld [vmem:[#allocation5 + $0x1ec] ss:$24 sps:$4 sm:$0xff]   ;;  %v4057_v59 = vld [vmem:[#allocation5 + $0x1e8] ss:$24 sps:$4 sm:$0xff]   ;;  %v4062_v60 = vld [vmem:[#allocation5 + $0x21c] ss:$24 sps:$4 sm:$0xff]  }
  0x70   :  { %v4060_v61 = vld [vmem:[#allocation5 + $0x218] ss:$24 sps:$4 sm:$0xff]   ;;  %v4065_v62 = vld [vmem:[#allocation5 + $0x24c] ss:$24 sps:$4 sm:$0xff]   ;;  %v4063_v63 = vld [vmem:[#allocation5 + $0x248] ss:$24 sps:$4 sm:$0xff]  }
  0x71   :  { %v4068_v0 = vld [vmem:[#allocation5 + $0x27c] ss:$24 sps:$4 sm:$0xff]   ;;  %v4066_v1 = vld [vmem:[#allocation5 + $0x278] ss:$24 sps:$4 sm:$0xff]   ;;  %v4071_v2 = vld [vmem:[#allocation5 + $0x2ac] ss:$24 sps:$4 sm:$0xff]  }
  0x72   :  { %688 = vmatpush1.bf16.msra.mxu0 %v3996_v11  ;;  %v4069_v3 = vld [vmem:[#allocation5 + $0x2a8] ss:$24 sps:$4 sm:$0xff]   ;;  %v4074_v4 = vld [vmem:[#allocation5 + $0x2dc] ss:$24 sps:$4 sm:$0xff]   ;;  %v4072_v5 = vld [vmem:[#allocation5 + $0x2d8] ss:$24 sps:$4 sm:$0xff]  }
  0x73   :  { %689 = vmatprep.subr.bf16.mxu0 %v3997_v12  ;;  %v4077_v6 = vld [vmem:[#allocation5 + $0x14] ss:$24 sps:$4 sm:$0xff]   ;;  %v4075_v7 = vld [vmem:[#allocation5 + $0x10] ss:$24 sps:$4 sm:$0xff]   ;;  %v4080_v8 = vld [vmem:[#allocation5 + $0x44] ss:$24 sps:$4 sm:$0xff]  }
  0x74   :  { %v4078_v9 = vld [vmem:[#allocation5 + $0x40] ss:$24 sps:$4 sm:$0xff]   ;;  %v4083_v10 = vld [vmem:[#allocation5 + $0x74] ss:$24 sps:$4 sm:$0xff]   ;;  %v4081_v11 = vld [vmem:[#allocation5 + $0x70] ss:$24 sps:$4 sm:$0xff]  }
  0x75   :  { %v4086_v12 = vld [vmem:[#allocation5 + $0xa4] ss:$24 sps:$4 sm:$0xff]   ;;  %v4084_v13 = vld [vmem:[#allocation5 + $0xa0] ss:$24 sps:$4 sm:$0xff]   ;;  %v4089_v14 = vld [vmem:[#allocation5 + $0xd4] ss:$24 sps:$4 sm:$0xff]  }
  0x76   :  { %690 = vmatpush1.bf16.msra.mxu0 %v3999_v16  ;;  %v4087_v16 = vld [vmem:[#allocation5 + $0xd0] ss:$24 sps:$4 sm:$0xff]   ;;  %v4122_v36 = vld [vmem:[#allocation5 + $0x2e4] ss:$24 sps:$4 sm:$0xff]   ;;  %s3485_s1 = sshll.u32 %s4548_s20, 4  ;;  %s3486_s1 = int_to_ptr.vmem [resolvable:$true] %s3485_s1 }
  0x77   :  { %691 = vmatprep.subr.bf16.mxu0 %v4000_v17  ;;  %v4092_v17 = vld [vmem:[#allocation5 + $0x104] ss:$24 sps:$4 sm:$0xff]   ;;  %v4117_v35 = vld [vmem:[#allocation5 + $0x2b0] ss:$24 sps:$4 sm:$0xff]   ;;  %p4508_p13 = scmp.lt.s32.totalorder %s3486_s1, %s3486_s1 }
  0x7a   :  { %692 = vmatpush1.bf16.msra.mxu0 %v4002_v18  ;;  %v4090_v18 = vld [vmem:[#allocation5 + $0x100] ss:$24 sps:$4 sm:$0xff]  }
  0x7b   :  { %693 = vmatprep.subr.bf16.mxu0 %v4003_v19  ;;  %v4093_v19 = vld [vmem:[#allocation5 + $0x130] ss:$24 sps:$4 sm:$0xff]  }
  0x7e   :  { %694 = vmatpush1.bf16.msra.mxu0 %v4005_v20  ;;  %v4098_v20 = vld [vmem:[#allocation5 + $0x164] ss:$24 sps:$4 sm:$0xff]  }
  0x7f   :  { %695 = vmatprep.subr.bf16.mxu0 %v4006_v21  ;;  %v4096_v21 = vld [vmem:[#allocation5 + $0x160] ss:$24 sps:$4 sm:$0xff]  }
  0x82   :  { %696 = vmatpush1.bf16.msra.mxu0 %v4008_v22  ;;  %v4101_v22 = vld [vmem:[#allocation5 + $0x194] ss:$24 sps:$4 sm:$0xff]  }
  0x83   :  { %697 = vmatprep.subr.bf16.mxu0 %v4009_v23  ;;  %v4099_v23 = vld [vmem:[#allocation5 + $0x190] ss:$24 sps:$4 sm:$0xff]  }
  0x86   :  { %698 = vmatpush1.bf16.msra.mxu0 %v4011_v24  ;;  %v4104_v24 = vld [vmem:[#allocation5 + $0x1c4] ss:$24 sps:$4 sm:$0xff]  }
  0x87   :  { %699 = vmatprep.subr.bf16.mxu0 %v4012_v25  ;;  %v4102_v25 = vld [vmem:[#allocation5 + $0x1c0] ss:$24 sps:$4 sm:$0xff]  }
  0x8a   :  { %700 = vmatpush1.bf16.msra.mxu0 %v4014_v26  ;;  %v4107_v26 = vld [vmem:[#allocation5 + $0x1f4] ss:$24 sps:$4 sm:$0xff]  }
  0x8b   :  { %701 = vmatprep.subr.bf16.mxu0 %v4015_v27  ;;  %v4105_v27 = vld [vmem:[#allocation5 + $0x1f0] ss:$24 sps:$4 sm:$0xff]  }
  0x8e   :  { %702 = vmatpush1.bf16.msra.mxu0 %v4017_v28  ;;  %v4110_v28 = vld [vmem:[#allocation5 + $0x224] ss:$24 sps:$4 sm:$0xff]  }
  0x8f   :  { %703 = vmatprep.subr.bf16.mxu0 %v4018_v29  ;;  %v4108_v29 = vld [vmem:[#allocation5 + $0x220] ss:$24 sps:$4 sm:$0xff]  }
  0x92   :  { %704 = vmatpush1.bf16.msra.mxu0 %v4020_v30  ;;  %v4113_v30 = vld [vmem:[#allocation5 + $0x254] ss:$24 sps:$4 sm:$0xff]  }
  0x93   :  { %705 = vmatprep.subr.bf16.mxu0 %v4021_v31  ;;  %v4111_v31 = vld [vmem:[#allocation5 + $0x250] ss:$24 sps:$4 sm:$0xff]  }
  0x96   :  { %706 = vmatpush1.bf16.msra.mxu0 %v4023_v32  ;;  %v4116_v32 = vld [vmem:[#allocation5 + $0x284] ss:$24 sps:$4 sm:$0xff]  }
  0x97   :  { %707 = vmatprep.subr.bf16.mxu0 %v4024_v33  ;;  %v4114_v33 = vld [vmem:[#allocation5 + $0x280] ss:$24 sps:$4 sm:$0xff]  }
  0x9a   :  { %708 = vmatpush1.bf16.msra.mxu0 %v4026_v34  ;;  %v4119_v34 = vld [vmem:[#allocation5 + $0x2b4] ss:$24 sps:$4 sm:$0xff]  }
  0x9b   :  { %720 = vmatprep.subr.bf16.mxu0 %v4029_v37  ;;  %v4120_v37 = vld [vmem:[#allocation5 + $0x2e0] ss:$24 sps:$4 sm:$0xff]  }
  0x9d   :  { %710 = vmatmul.mubr.bf16.vlgmr.msra.gmra.mrb[0].mxu0 %v4650_v39 }
  0x9e   :  { %721 = vmatpush1.bf16.msra.mxu0 %v4027_v38  ;;  %752 = vmatprep.mubr.bf16.mxu0 %v4647_v15  ;;  %v4546_v38 = vmov 0.0  }
  0x9f   :  { %722 = vmatprep.subr.bf16.mxu0 %v4032_v40  ;;  %3927 = vmatprep.subr.bf16.mxu1 %v4546_v38 }
  0xa0   :  { %3929 = vmatprep.mubr.msk.bf16.mxu1 %vm4547_vm0, %v4546_v38 }
  0xa2   :  { %723 = vmatpush1.bf16.msra.mxu0 %v4030_v41 }
  0xa3   :  { %724 = vmatprep.subr.bf16.mxu0 %v4035_v42 }
  0xa6   :  { %725 = vmatpush1.bf16.msra.mxu0 %v4033_v43 }
  0xa7   :  { %726 = vmatprep.subr.bf16.mxu0 %v4038_v44 }
  0xaa   :  { %727 = vmatpush1.bf16.msra.mxu0 %v4036_v45 }
  0xab   :  { %728 = vmatprep.subr.bf16.mxu0 %v4041_v46 }
  0xae   :  { %729 = vmatpush1.bf16.msra.mxu0 %v4039_v47 }
  0xaf   :  { %730 = vmatprep.subr.bf16.mxu0 %v4044_v48 }
  0xb2   :  { %731 = vmatpush1.bf16.msra.mxu0 %v4042_v49 }
  0xb3   :  { %732 = vmatprep.subr.bf16.mxu0 %v4047_v50 }
  0xb6   :  { %733 = vmatpush1.bf16.msra.mxu0 %v4045_v51 }
  0xb7   :  { %734 = vmatprep.subr.bf16.mxu0 %v4050_v52 }
  0xba   :  { %735 = vmatpush1.bf16.msra.mxu0 %v4048_v53 }
  0xbb   :  { %736 = vmatprep.subr.bf16.mxu0 %v4053_v54 }
  0xbe   :  { %737 = vmatpush1.bf16.msra.mxu0 %v4051_v55 }
  0xbf   :  { %738 = vmatprep.subr.bf16.mxu0 %v4056_v56 }
  0xc2   :  { %739 = vmatpush1.bf16.msra.mxu0 %v4054_v57 }
  0xc3   :  { %740 = vmatprep.subr.bf16.mxu0 %v4059_v58 }
  0xc6   :  { %741 = vmatpush1.bf16.msra.mxu0 %v4057_v59 }
  0xc7   :  { %742 = vmatprep.subr.bf16.mxu0 %v4062_v60 }
  0xca   :  { %743 = vmatpush1.bf16.msra.mxu0 %v4060_v61 }
  0xcb   :  { %744 = vmatprep.subr.bf16.mxu0 %v4065_v62 }
  0xce   :  { %745 = vmatpush1.bf16.msra.mxu0 %v4063_v63 }
  0xcf   :  { %746 = vmatprep.subr.bf16.mxu0 %v4068_v0 }
  0xd2   :  { %747 = vmatpush1.bf16.msra.mxu0 %v4066_v1 }
  0xd3   :  { %748 = vmatprep.subr.bf16.mxu0 %v4071_v2 }
  0xd6   :  { %749 = vmatpush1.bf16.msra.mxu0 %v4069_v3 }
  0xd7   :  { %750 = vmatprep.subr.bf16.mxu0 %v4074_v4 }
  0xda   :  { %751 = vmatpush1.bf16.msra.mxu0 %v4072_v5 }
  0xdb   :  { %763 = vmatprep.subr.bf16.mxu0 %v4077_v6 }
  0xdd   :  { %753 = vmatmul.mubr.bf16.vlgmr.msra.gmra.mrb[4].mxu0 %v4650_v39 }
  0xde   :  { %764 = vmatpush1.bf16.msra.mxu0 %v4075_v7  ;;  %795 = vmatprep.mubr.bf16.mxu0 %v4647_v15  ;;  %v4095_v15 = vld [vmem:[#allocation5 + $0x134] ss:$24 sps:$4 sm:$0xff]  }
  0xdf   :  { %765 = vmatprep.subr.bf16.mxu0 %v4080_v8 }
  0xe2   :  { %766 = vmatpush1.bf16.msra.mxu0 %v4078_v9 }
  0xe3   :  { %767 = vmatprep.subr.bf16.mxu0 %v4083_v10 }
  0xe6   :  { %768 = vmatpush1.bf16.msra.mxu0 %v4081_v11 }
  0xe7   :  { %769 = vmatprep.subr.bf16.mxu0 %v4086_v12 }
  0xea   :  { %770 = vmatpush1.bf16.msra.mxu0 %v4084_v13 }
  0xeb   :  { %771 = vmatprep.subr.bf16.mxu0 %v4089_v14 }
  0xee   :  { %772 = vmatpush1.bf16.msra.mxu0 %v4087_v16 }
  0xef   :  { %773 = vmatprep.subr.bf16.mxu0 %v4092_v17 }
  0xf2   :  { %774 = vmatpush1.bf16.msra.mxu0 %v4090_v18 }
  0xf3   :  { %775 = vmatprep.subr.bf16.mxu0 %v4095_v15 }
  0xf6   :  { %776 = vmatpush1.bf16.msra.mxu0 %v4093_v19 }
  0xf7   :  { %777 = vmatprep.subr.bf16.mxu0 %v4098_v20 }
  0xfa   :  { %778 = vmatpush1.bf16.msra.mxu0 %v4096_v21 }
  0xfb   :  { %779 = vmatprep.subr.bf16.mxu0 %v4101_v22 }
  0xfe   :  { %780 = vmatpush1.bf16.msra.mxu0 %v4099_v23 }
  0xff   :  { %781 = vmatprep.subr.bf16.mxu0 %v4104_v24 }
 0x102   :  { %782 = vmatpush1.bf16.msra.mxu0 %v4102_v25 }
 0x103   :  { %783 = vmatprep.subr.bf16.mxu0 %v4107_v26 }
 0x106   :  { %784 = vmatpush1.bf16.msra.mxu0 %v4105_v27 }
 0x107   :  { %785 = vmatprep.subr.bf16.mxu0 %v4110_v28 }
 0x10a   :  { %786 = vmatpush1.bf16.msra.mxu0 %v4108_v29 }
 0x10b   :  { %787 = vmatprep.subr.bf16.mxu0 %v4113_v30 }
 0x10e   :  { %788 = vmatpush1.bf16.msra.mxu0 %v4111_v31 }
 0x10f   :  { %789 = vmatprep.subr.bf16.mxu0 %v4116_v32 }
 0x112   :  { %790 = vmatpush1.bf16.msra.mxu0 %v4114_v33 }
 0x113   :  { %791 = vmatprep.subr.bf16.mxu0 %v4119_v34 }
 0x116   :  { %792 = vmatpush1.bf16.msra.mxu0 %v4117_v35 }
 0x117   :  { %793 = vmatprep.subr.bf16.mxu0 %v4122_v36 }
 0x11a   :  { %794 = vmatpush1.bf16.msra.mxu0 %v4120_v37 }
 0x11b   :  { %3903 = vmatprep.subr.bf16.mxu0 %v4546_v38 }
 0x11d   :  { %796 = vmatmul.mubr.bf16.vlgmr.msra.gmra.mrb[8].mxu0 %v4650_v39 }
 0x11e   :  { %3905 = vmatprep.mubr.msk.bf16.mxu0 %vm4547_vm0, %v4546_v38 }
 0x170   :  { %v711_v40 = vpop.f32.mrb[0].mxu0 }
 0x171   :  { %v713_v41 = vpop.f32.mrb[1].mxu0  ;;  %v806_v48 = vpack.c.bf16 %v711_v40, %v711_v40 }
 0x172   :  { %v715_v42 = vpop.f32.mrb[2].mxu0  ;;  %v808_v52 = vpack.c.bf16 %v713_v41, %v713_v41 }
 0x173   :  { %v717_v43 = vpop.f32.mrb[3].mxu0  ;;  %v807_v50 = vpack.c.bf16 %v715_v42, %v715_v42 }
 0x174   :  { %v809_v54 = vpack.c.bf16 %v717_v43, %v717_v43 }
 0x1b0   :  { %v754_v44 = vpop.f32.mrb[4].mxu0 }
 0x1b1   :  { %v810_v45 = vpack.c.bf16 %v754_v44, %v754_v44  ;;  %v756_v46 = vpop.f32.mrb[5].mxu0 }
 0x1b2   :  { %v758_v39 = vpop.f32.mrb[6].mxu0  ;;  %v812_v51 = vpack.c.bf16 %v756_v46, %v756_v46  ;;  %v4125_v46 = vld [vmem:[#allocation7 + $0x4] ss:$8 sps:$4 sm:$0xff]  }
 0x1b3   :  { %v760_v47 = vpop.f32.mrb[7].mxu0  ;;  %3904 = vmatpush3.bf16.xpose.msra.mxu0 %v810_v45  ;;  %v811_v49 = vpack.c.bf16 %v758_v39, %v758_v39  ;;  %v4123_v45 = vld [vmem:[#allocation7] ss:$8 sps:$4 sm:$0xff]   ;;  %v4128_v39 = vld [vmem:[#allocation7 + $0x14] ss:$8 sps:$4 sm:$0xff]  }
 0x1b4   :  { %3909 = vmatprep.subr.bf16.mxu0 %v4546_v38  ;;  %v813_v53 = vpack.c.bf16 %v760_v47, %v760_v47  ;;  %v4126_v47 = vld [vmem:[#allocation7 + $0x10] ss:$8 sps:$4 sm:$0xff]  }
 0x1ba   :  { %3906 = vmatmul.mubr.bf16.vlgmr.msra.gmra.mrb[12].mxu0 %v806_v48  ;;  %v4131_v48 = vld [vmem:[#allocation7 + $0x24] ss:$8 sps:$4 sm:$0xff]  }
 0x1bb   :  { %3910 = vmatpush3.bf16.xpose.msra.mxu0 %v811_v49  ;;  %3911 = vmatprep.mubr.msk.bf16.mxu0 %vm4547_vm0, %v4546_v38  ;;  %v4129_v49 = vld [vmem:[#allocation7 + $0x20] ss:$8 sps:$4 sm:$0xff]  }
 0x1bc   :  { %3915 = vmatprep.subr.bf16.mxu0 %v4546_v38 }
 0x1c2   :  { %3912 = vmatmul.mubr.bf16.vlgmr.msra.gmra.mrb[16].mxu0 %v807_v50  ;;  %v4134_v50 = vld [vmem:[#allocation7 + $0x34] ss:$8 sps:$4 sm:$0xff]  }
 0x1c3   :  { %3916 = vmatpush3.bf16.xpose.msra.mxu0 %v812_v51  ;;  %3917 = vmatprep.mubr.msk.bf16.mxu0 %vm4547_vm0, %v4546_v38  ;;  %v4132_v51 = vld [vmem:[#allocation7 + $0x30] ss:$8 sps:$4 sm:$0xff]  }
 0x1c4   :  { %3921 = vmatprep.subr.bf16.mxu0 %v4546_v38 }
 0x1ca   :  { %3918 = vmatmul.mubr.bf16.vlgmr.msra.gmra.mrb[20].mxu0 %v808_v52  ;;  %v4137_v52 = vld [vmem:[#allocation7 + $0x44] ss:$8 sps:$4 sm:$0xff]  }
 0x1cb   :  { %3922 = vmatpush3.bf16.xpose.msra.mxu0 %v813_v53  ;;  %3923 = vmatprep.mubr.msk.bf16.mxu0 %vm4547_vm0, %v4546_v38  ;;  %v4135_v53 = vld [vmem:[#allocation7 + $0x40] ss:$8 sps:$4 sm:$0xff]  }
 0x1cc   :  { %1414 = vmatprep.subr.bf16.mxu0 %v4125_v46 }
 0x1d2   :  { %3924 = vmatmul.mubr.bf16.vlgmr.msra.gmra.mrb[24].mxu0 %v809_v54  ;;  %v4140_v54 = vld [vmem:[#allocation7 + $0x54] ss:$8 sps:$4 sm:$0xff]  }
 0x1d3   :  { %1415 = vmatpush1.bf16.msra.mxu0 %v4123_v45 }
 0x1d4   :  { %1416 = vmatprep.subr.bf16.mxu0 %v4128_v39  ;;  %v1524_v39 = vld [vmem:[#allocation8] sm:$0xff] }
 0x1d7   :  { %1417 = vmatpush1.bf16.msra.mxu0 %v4126_v47  ;;  %v1528_v47 = vld [vmem:[#allocation8 + $0x20] sm:$0xff] }
 0x1d8   :  { %1418 = vmatprep.subr.bf16.mxu0 %v4131_v48  ;;  %v1525_v48 = vld [vmem:[#allocation8 + $0x8] sm:$0xff] }
 0x1db   :  { %1419 = vmatpush1.bf16.msra.mxu0 %v4129_v49  ;;  %v3631_v49 = vcombine.low %v1524_v39, %v1528_v47 }
 0x1dc   :  { %1420 = vmatprep.subr.bf16.mxu0 %v4134_v50  ;;  %v3632_v50 = vcombine.high %v1524_v39, %v1528_v47  ;;  %v1589_v39 = vld [vmem:[#allocation8 + $0x208] sm:$0xff] }
 0x1dd   :  { %v1593_v47 = vld [vmem:[#allocation8 + $0x228] sm:$0xff] }
 0x1df   :  { %1421 = vmatpush1.bf16.msra.mxu0 %v4132_v51  ;;  %v1529_v51 = vld [vmem:[#allocation8 + $0x28] sm:$0xff] }
 0x1e0   :  { %1422 = vmatprep.subr.bf16.mxu0 %v4137_v52  ;;  %v1532_v52 = vld [vmem:[#allocation8 + $0x40] sm:$0xff] }
 0x1e3   :  { %1423 = vmatpush1.bf16.msra.mxu0 %v4135_v53  ;;  %v1536_v53 = vld [vmem:[#allocation8 + $0x60] sm:$0xff] }
 0x1e4   :  { %1424 = vmatprep.subr.bf16.mxu0 %v4140_v54  ;;  %v3633_v54 = vcombine.low %v1525_v48, %v1529_v51 }
 0x1f0   :  { %v797_v55 = vpop.f32.mrb[8].mxu0 }
 0x1f1   :  { %v814_v56 = vpack.c.bf16 %v797_v55, %v797_v55  ;;  %v799_v57 = vpop.f32.mrb[9].mxu0  ;;  %v4138_v55 = vld [vmem:[#allocation7 + $0x50] ss:$8 sps:$4 sm:$0xff]  }
 0x1f2   :  { %v816_v58 = vpack.c.bf16 %v799_v57, %v799_v57  ;;  %v801_v59 = vpop.f32.mrb[10].mxu0  ;;  %1425 = vmatpush1.bf16.msra.mxu0 %v4138_v55  ;;  %v4141_v57 = vld [vmem:[#allocation7 + $0x60] ss:$8 sps:$4 sm:$0xff]   ;;  %v3634_v55 = vcombine.high %v1525_v48, %v1529_v51  ;;  %v3698_v51 = vcombine.high %v1589_v39, %v1593_v47 }
 0x1f3   :  { %v815_v60 = vpack.c.bf16 %v801_v59, %v801_v59  ;;  %v803_v61 = vpop.f32.mrb[11].mxu0  ;;  %v1032_v62 = vsel %vm1030_vm1, %v814_v56, 0  ;;  %v4143_v56 = vld [vmem:[#allocation7 + $0x64] ss:$8 sps:$4 sm:$0xff]   ;;  %v4144_v59 = vld [vmem:[#allocation7 + $0x70] ss:$8 sps:$4 sm:$0xff]  }
 0x1f4   :  { %v4672_v63 = vsel %vm1030_vm1, %v816_v58, 0  ;;  %v817_v0 = vpack.c.bf16 %v803_v61, %v803_v61  ;;  %3928 = vmatpush3.bf16.msra.mxu1 %v1032_v62  ;;  %1426 = vmatprep.subr.bf16.mxu0 %v4143_v56  ;;  %v4146_v58 = vld [vmem:[#allocation7 + $0x74] ss:$8 sps:$4 sm:$0xff]   ;;  %v4147_v61 = vld [vmem:[#allocation7 + $0x80] ss:$8 sps:$4 sm:$0xff]   ;;  %v3640_v56 = vcombine.high %v1532_v52, %v1536_v53 }
 0x1f5   :  { %v4674_v1 = vsel %vm1030_vm1, %v815_v60, 0  ;;  %3933 = vmatprep.subr.bf16.mxu1 %v4546_v38  ;;  %v4149_v60 = vld [vmem:[#allocation7 + $0x84] ss:$8 sps:$4 sm:$0xff]  }
 0x1f6   :  { %v4677_v2 = vsel %vm1030_vm1, %v817_v0, 0  ;;  %1427 = vmatpush1.bf16.msra.mxu0 %v4141_v57  ;;  %v1533_v57 = vld [vmem:[#allocation8 + $0x48] sm:$0xff] }
 0x1f7   :  { %1428 = vmatprep.subr.bf16.mxu0 %v4146_v58  ;;  %v1537_v58 = vld [vmem:[#allocation8 + $0x68] sm:$0xff] }
 0x1fa   :  { %1429 = vmatpush1.bf16.msra.mxu0 %v4144_v59  ;;  %v1540_v59 = vld [vmem:[#allocation8 + $0x80] sm:$0xff] }
 0x1fb   :  { %1430 = vmatprep.subr.bf16.mxu0 %v4149_v60  ;;  %v3642_v60 = vcombine.high %v1533_v57, %v1537_v58 }
 0x1fe   :  { %1431 = vmatpush1.bf16.msra.mxu0 %v4147_v61  ;;  %v1544_v61 = vld [vmem:[#allocation8 + $0xa0] sm:$0xff] }
 0x28d   :  { %v852_v3 = vpop.f32.mrb[12].mxu0 }
 0x28e   :  { %v3907_v4 = vpop.f32.mrb[13].mxu0  ;;  %v979_v5 = vsel %vm978_vm2, %v852_v3, -inf }
 0x28f   :  { %980 = vmax.xlane.f32.xlu0 %v979_v5  ;;  %v855_v6 = vpop.f32.mrb[14].mxu0 }
 0x290   :  { %v3908_v7 = vpop.f32.mrb[15].mxu0 }
 0x295   :  { %v892_v8 = vpop.f32.mrb[16].mxu0 }
 0x296   :  { %v3913_v9 = vpop.f32.mrb[17].mxu0  ;;  %v982_v10 = vsel %vm978_vm2, %v892_v8, -inf }
 0x297   :  { %983 = vmax.xlane.f32.xlu0 %v982_v10  ;;  %v895_v11 = vpop.f32.mrb[18].mxu0 }
 0x298   :  { %v3914_v12 = vpop.f32.mrb[19].mxu0 }
 0x29d   :  { %v932_v13 = vpop.f32.mrb[20].mxu0 }
 0x29e   :  { %v3919_v14 = vpop.f32.mrb[21].mxu0  ;;  %v985_v16 = vsel %vm978_vm2, %v932_v13, -inf }
 0x29f   :  { %986 = vmax.xlane.f32.xlu1 %v985_v16  ;;  %v935_v17 = vpop.f32.mrb[22].mxu0  ;;  %v4152_v16 = vld [vmem:[#allocation7 + $0x94] ss:$8 sps:$4 sm:$0xff]  }
 0x2a0   :  { %v3920_v18 = vpop.f32.mrb[23].mxu0  ;;  %v4150_v17 = vld [vmem:[#allocation7 + $0x90] ss:$8 sps:$4 sm:$0xff]   ;;  %1432 = vmatprep.subr.bf16.mxu0 %v4152_v16  ;;  %v1557_v16 = vld [vmem:[#allocation8 + $0x108] sm:$0xff] }
 0x2a1   :  { %1433 = vmatpush1.bf16.msra.mxu0 %v4150_v17  ;;  %v4153_v18 = vld [vmem:[#allocation7 + $0xa0] ss:$8 sps:$4 sm:$0xff]  }
 0x2a2   :  { %v1561_v17 = vld [vmem:[#allocation8 + $0x128] sm:$0xff] }
 0x2a5   :  { %v972_v15 = vpop.f32.mrb[24].mxu0 }
 0x2a6   :  { %v3925_v19 = vpop.f32.mrb[25].mxu0  ;;  %v988_v20 = vsel %vm978_vm2, %v972_v15, -inf }
 0x2a7   :  { %989 = vmax.xlane.f32.xlu1 %v988_v20  ;;  %v975_v21 = vpop.f32.mrb[26].mxu0  ;;  %v4158_v19 = vld [vmem:[#allocation7 + $0xb4] ss:$8 sps:$4 sm:$0xff]   ;;  %v4156_v20 = vld [vmem:[#allocation7 + $0xb0] ss:$8 sps:$4 sm:$0xff]  }
 0x2a8   :  { %v3926_v22 = vpop.f32.mrb[27].mxu0  ;;  %v4164_v21 = vld [vmem:[#allocation7 + $0xd4] ss:$8 sps:$4 sm:$0xff]  }
 0x2a9   :  { %v4162_v22 = vld [vmem:[#allocation7 + $0xd0] ss:$8 sps:$4 sm:$0xff]  }
 0x31c   :  { %v981_v23 = vpop.xlane.xlu0 %980 }
 0x31d   :  { %v991_v24 = vsub.f32 %v852_v3, %v981_v23  ;;  %v4165_v23 = vld [vmem:[#allocation7 + $0xe0] ss:$8 sps:$4 sm:$0xff]  }
 0x31f   :  { %v995_v25 = vmul.f32 1.442695, %v991_v24  ;;  %v4167_v24 = vld [vmem:[#allocation7 + $0xe4] ss:$8 sps:$4 sm:$0xff]  }
 0x321   :  { %4363 = vpow2.f32 %v995_v25  ;;  %v4170_v25 = vld [vmem:[#allocation7 + $0xf4] ss:$8 sps:$4 sm:$0xff]  }
 0x324   :  { %v984_v26 = vpop.xlane.xlu0 %983 }
 0x325   :  { %v992_v27 = vsub.f32 %v892_v8, %v984_v26  ;;  %v4168_v26 = vld [vmem:[#allocation7 + $0xf0] ss:$8 sps:$4 sm:$0xff]  }
 0x327   :  { %v997_v28 = vmul.f32 1.442695, %v992_v27 }
 0x329   :  { %4365 = vpow2.f32 %v997_v28 }
 0x32b   :  { %v4364_v29 = vpop.eup %4363 }
 0x32c   :  { %v987_v30 = vpop.xlane.xlu1 %986  ;;  %v1003_v31 = vsel %vm978_vm2, %v4364_v29, 0.0 }
 0x32d   :  { %v993_v32 = vsub.f32 %v932_v13, %v987_v30  ;;  %1004 = vadd.xlane.f32.xlu0 %v1003_v31 }
 0x32f   :  { %v999_v33 = vmul.f32 1.442695, %v993_v32 }
 0x331   :  { %4367 = vpow2.f32 %v999_v33 }
 0x333   :  { %v4684_v34 = vpop.eup %4365 }
 0x334   :  { %v990_v35 = vpop.xlane.xlu1 %989  ;;  %v1006_v36 = vsel %vm978_vm2, %v4684_v34, 0.0 }
 0x335   :  { %v994_v37 = vsub.f32 %v972_v15, %v990_v35  ;;  %1007 = vadd.xlane.f32.xlu1 %v1006_v36  ;;  %v4155_v15 = vld [vmem:[#allocation7 + $0xa4] ss:$8 sps:$4 sm:$0xff]  }
 0x336   :  { %1434 = vmatprep.subr.bf16.mxu0 %v4155_v15 }
 0x337   :  { %v1001_v40 = vmul.f32 1.442695, %v994_v37  ;;  %1435 = vmatpush1.bf16.msra.mxu0 %v4153_v18 }
 0x338   :  { %1436 = vmatprep.subr.bf16.mxu0 %v4158_v19 }
 0x339   :  { %4369 = vpow2.f32 %v1001_v40 }
 0x33b   :  { %v4688_v41 = vpop.eup %4367  ;;  %1437 = vmatpush1.bf16.msra.mxu0 %v4156_v20  ;;  %v3666_v20 = vcombine.high %v1557_v16, %v1561_v17 }
 0x33c   :  { %v1009_v42 = vsel %vm978_vm2, %v4688_v41, 0.0 }
 0x33d   :  { %1010 = vadd.xlane.f32.xlu0 %v1009_v42 }
 0x343   :  { %v4692_v43 = vpop.eup %4369 }
 0x344   :  { %v1012_v44 = vsel %vm978_vm2, %v4692_v43, 0.0 }
 0x345   :  { %1013 = vadd.xlane.f32.xlu1 %v1012_v44 }
 0x3ba   :  { %v1005_v62 = vpop.xlane.xlu0 %1004 }
 0x3bb   :  { %4371 = vrcp.f32 %v1005_v62  ;;  %v1541_v62 = vld [vmem:[#allocation8 + $0x88] sm:$0xff] }
 0x3c2   :  { %v1008_v0 = vpop.xlane.xlu1 %1007 }
 0x3c3   :  { %4373 = vrcp.f32 %v1008_v0  ;;  %v1545_v0 = vld [vmem:[#allocation8 + $0xa8] sm:$0xff] }
 0x3c5   :  { %v4372_v3 = vpop.eup %4371 }
 0x3c6   :  { %v1019_v4 = vmul.f32 %v4372_v3, %v4364_v29  ;;  %v3639_v3 = vcombine.low %v1532_v52, %v1536_v53  ;;  %v3697_v53 = vcombine.low %v1589_v39, %v1593_v47  ;;  %v1624_v39 = vld [vmem:[#allocation8 + $0x320] sm:$0xff]  ;;  %v1621_v47 = vld [vmem:[#allocation8 + $0x308] sm:$0xff] }
 0x3c8   :  { %v1023_v5 = vpack.c.bf16 %v1019_v4, %v1019_v4  ;;  %v3641_v4 = vcombine.low %v1533_v57, %v1537_v58  ;;  %v4720_v57 = vld [vmem:[%s4861_s5] sm:$0xff]  ;;  %v4725_v58 = vld [vmem:[%s4861_s5 + $0x8] sm:$0xff] }
 0x3ca   :  { %3930 = vmatmul.mubr.msk.bf16.vlgmr.msra.gmra.mrb[0].mxu1 %vm978_vm2, %v1023_v5  ;;  %v1011_v6 = vpop.xlane.xlu0 %1010  ;;  %v3648_v5 = vcombine.high %v1540_v59, %v1544_v61 }
 0x3cb   :  { %3934 = vmatpush3.bf16.msra.mxu1 %v4674_v1  ;;  %4375 = vrcp.f32 %v1011_v6  ;;  %3935 = vmatprep.mubr.msk.bf16.mxu1 %vm4547_vm0, %v4546_v38  ;;  %v3650_v6 = vcombine.high %v1541_v62, %v1545_v0 }
 0x3cc   :  { %3939 = vmatprep.subr.bf16.mxu1 %v4546_v38 }
 0x3cd   :  { %v4374_v7 = vpop.eup %4373 }
 0x3ce   :  { %v1020_v8 = vmul.f32 %v4374_v7, %v4684_v34  ;;  %v1548_v7 = vld [vmem:[#allocation8 + $0xc0] sm:$0xff] }
 0x3d0   :  { %v1024_v9 = vpack.c.bf16 %v1020_v8, %v1020_v8  ;;  %v1552_v8 = vld [vmem:[#allocation8 + $0xe0] sm:$0xff] }
 0x3d1   :  { %v3655_v18 = vcombine.low %v1548_v7, %v1552_v8 }
 0x3d2   :  { %3936 = vmatmul.mubr.msk.bf16.vlgmr.msra.gmra.mrb[4].mxu1 %vm978_vm2, %v1024_v9  ;;  %v1014_v10 = vpop.xlane.xlu1 %1013  ;;  %v1549_v9 = vld [vmem:[#allocation8 + $0xc8] sm:$0xff] }
 0x3d3   :  { %3940 = vmatpush3.bf16.msra.mxu1 %v4672_v63  ;;  %4377 = vrcp.f32 %v1014_v10  ;;  %3941 = vmatprep.mubr.msk.bf16.mxu1 %vm4547_vm0, %v4546_v38  ;;  %v1553_v10 = vld [vmem:[#allocation8 + $0xe8] sm:$0xff] }
 0x3d4   :  { %3945 = vmatprep.subr.bf16.mxu1 %v4546_v38  ;;  %v3657_v15 = vcombine.low %v1549_v9, %v1553_v10 }
 0x3d5   :  { %v4376_v1 = vpop.eup %4375 }
 0x3d6   :  { %v1021_v11 = vmul.f32 %v4376_v1, %v4688_v41  ;;  %v3647_v1 = vcombine.low %v1540_v59, %v1544_v61 }
 0x3d8   :  { %v1025_v12 = vpack.c.bf16 %v1021_v11, %v1021_v11  ;;  %v3649_v11 = vcombine.low %v1541_v62, %v1545_v0 }
 0x3da   :  { %3942 = vmatmul.mubr.msk.bf16.vlgmr.msra.gmra.mrb[8].mxu1 %vm978_vm2, %v1025_v12  ;;  %v3656_v12 = vcombine.high %v1548_v7, %v1552_v8 }
 0x3db   :  { %3946 = vmatpush3.bf16.msra.mxu1 %v4677_v2  ;;  %3947 = vmatprep.mubr.msk.bf16.mxu1 %vm4547_vm0, %v4546_v38  ;;  %v4159_v2 = vld [vmem:[#allocation7 + $0xc0] ss:$8 sps:$4 sm:$0xff]   ;;  %v4161_v38 = vld [vmem:[#allocation7 + $0xc4] ss:$8 sps:$4 sm:$0xff]  }
 0x3dc   :  { %1438 = vmatprep.subr.bf16.mxu0 %v4161_v38  ;;  %2292 = vmatprep.subr.bf16.mxu1 %v3632_v50  ;;  %v1568_v38 = vld [vmem:[#allocation8 + $0x160] sm:$0xff] }
 0x3dd   :  { %v4378_v13 = vpop.eup %4377  ;;  %1439 = vmatpush1.bf16.msra.mxu0 %v4159_v2  ;;  %v1564_v2 = vld [vmem:[#allocation8 + $0x140] sm:$0xff] }
 0x3de   :  { %v1022_v63 = vmul.f32 %v4378_v13, %v4692_v43  ;;  %1440 = vmatprep.subr.bf16.mxu0 %v4164_v21  ;;  %v3658_v13 = vcombine.high %v1549_v9, %v1553_v10  ;;  %v1565_v21 = vld [vmem:[#allocation8 + $0x148] sm:$0xff] }
 0x3df   :  { %v4388_v9 = vld [vmem:[#allocation2 + $0x8] sm:$0xff] }
 0x3e0   :  { %v1026_v14 = vpack.c.bf16 %v1022_v63, %v1022_v63  ;;  %v1556_v63 = vld [vmem:[#allocation8 + $0x100] sm:$0xff] }
 0x3e1   :  { %1441 = vmatpush1.bf16.msra.mxu0 %v4162_v22  ;;  %v1569_v22 = vld [vmem:[#allocation8 + $0x168] sm:$0xff] }
 0x3e2   :  { %3948 = vmatmul.mubr.msk.bf16.vlgmr.msra.gmra.mrb[12].mxu1 %vm978_vm2, %v1026_v14  ;;  %1442 = vmatprep.subr.bf16.mxu0 %v4167_v24  ;;  %v1560_v14 = vld [vmem:[#allocation8 + $0x120] sm:$0xff]  ;;  %v3665_v24 = vcombine.low %v1557_v16, %v1561_v17 }
 0x3e3   :  { %2293 = vmatpush1.bf16.msra.mxu1 %v3631_v49  ;;  %v3664_v19 = vcombine.high %v1556_v63, %v1560_v14 }
 0x3e4   :  { %2294 = vmatprep.subr.bf16.mxu1 %v3640_v56 }
 0x3e5   :  { %1443 = vmatpush1.bf16.msra.mxu0 %v4165_v23  ;;  %v3663_v23 = vcombine.low %v1556_v63, %v1560_v14 }
 0x3e6   :  { %1444 = vmatprep.subr.bf16.mxu0 %v4170_v25  ;;  %v3672_v25 = vcombine.high %v1564_v2, %v1568_v38 }
 0x3e7   :  { %2295 = vmatpush1.bf16.msra.mxu1 %v3639_v3 }
 0x3e8   :  { %2296 = vmatprep.subr.bf16.mxu1 %v3648_v5  ;;  %v4387_v5 = vld [vmem:[#allocation2] sm:$0xff] }
 0x3e9   :  { %1445 = vmatpush1.bf16.msra.mxu0 %v4168_v26  ;;  %v3674_v26 = vcombine.high %v1565_v21, %v1569_v22 }
 0x3ea   :  { %2335 = vmatprep.subr.bf16.mxu0 %v3634_v55 }
 0x3eb   :  { %2297 = vmatpush1.bf16.msra.mxu1 %v3647_v1 }
 0x3ec   :  { %2298 = vmatprep.subr.bf16.mxu1 %v3656_v12 }
 0x3ef   :  { %2299 = vmatpush1.bf16.msra.mxu1 %v3655_v18 }
 0x3f0   :  { %2300 = vmatprep.subr.bf16.mxu1 %v3664_v19 }
 0x3f3   :  { %2301 = vmatpush1.bf16.msra.mxu1 %v3663_v23 }
 0x3f4   :  { %2302 = vmatprep.subr.bf16.mxu1 %v3672_v25 }
 0x49d   :  { %v1068_v27 = vpop.f32.mrb[0].mxu1 }
 0x49e   :  { %v3931_v28 = vpop.f32.mrb[1].mxu1 }
 0x49f   :  { %v1071_v29 = vpop.f32.mrb[2].mxu1  ;;  %v1576_v28 = vld [vmem:[#allocation8 + $0x1a0] sm:$0xff] }
 0x4a0   :  { %v3932_v30 = vpop.f32.mrb[3].mxu1  ;;  %v1573_v29 = vld [vmem:[#allocation8 + $0x188] sm:$0xff] }
 0x4a1   :  { %v1577_v30 = vld [vmem:[#allocation8 + $0x1a8] sm:$0xff] }
 0x4a5   :  { %v1114_v31 = vpop.f32.mrb[4].mxu1 }
 0x4a6   :  { %v1212_v32 = vpack.c.bf16 %v1114_v31, %v1068_v27  ;;  %v3937_v33 = vpop.f32.mrb[5].mxu1  ;;  %v1572_v27 = vld [vmem:[#allocation8 + $0x180] sm:$0xff]  ;;  %v3671_v31 = vcombine.low %v1564_v2, %v1568_v38 }
 0x4a7   :  { %v1117_v34 = vpop.f32.mrb[6].mxu1  ;;  %v3680_v33 = vcombine.high %v1572_v27, %v1576_v28  ;;  %v1596_v38 = vld [vmem:[#allocation8 + $0x240] sm:$0xff] }
 0x4a8   :  { %v3938_v35 = vpop.f32.mrb[7].mxu1  ;;  %v3682_v34 = vcombine.high %v1573_v29, %v1577_v30  ;;  %2303 = vmatpush1.bf16.msra.mxu1 %v3671_v31 }
 0x4a9   :  { %v1580_v35 = vld [vmem:[#allocation8 + $0x1c0] sm:$0xff]  ;;  %2304 = vmatprep.subr.bf16.mxu1 %v3680_v33 }
 0x4ad   :  { %v1160_v36 = vpop.f32.mrb[8].mxu1 }
 0x4ae   :  { %v3943_v37 = vpop.f32.mrb[9].mxu1 }
 0x4af   :  { %v1163_v40 = vpop.f32.mrb[10].mxu1  ;;  %v1581_v37 = vld [vmem:[#allocation8 + $0x1c8] sm:$0xff] }
 0x4b0   :  { %v3944_v41 = vpop.f32.mrb[11].mxu1  ;;  %v1585_v40 = vld [vmem:[#allocation8 + $0x1e8] sm:$0xff] }
 0x4b1   :  { %v3679_v41 = vcombine.low %v1572_v27, %v1576_v28  ;;  %v3689_v49 = vcombine.low %v1581_v37, %v1585_v40  ;;  %v1604_v28 = vld [vmem:[#allocation8 + $0x280] sm:$0xff] }
 0x4b3   :  { %2305 = vmatpush1.bf16.msra.mxu1 %v3679_v41 }
 0x4b5   :  { %v1206_v42 = vpop.f32.mrb[12].mxu1 }
 0x4b6   :  { %v1213_v43 = vpack.c.bf16 %v1206_v42, %v1160_v36  ;;  %v3949_v44 = vpop.f32.mrb[13].mxu1  ;;  %v1584_v36 = vld [vmem:[#allocation8 + $0x1e0] sm:$0xff]  ;;  %v3681_v42 = vcombine.low %v1573_v29, %v1577_v30  ;;  %v1605_v30 = vld [vmem:[#allocation8 + $0x288] sm:$0xff] }
 0x4b7   :  { %v1209_v45 = vpop.f32.mrb[14].mxu1  ;;  %v3690_v44 = vcombine.high %v1581_v37, %v1585_v40  ;;  %v3687_v48 = vcombine.low %v1580_v35, %v1584_v36  ;;  %v1608_v29 = vld [vmem:[#allocation8 + $0x2a0] sm:$0xff]  ;;  %v1613_v40 = vld [vmem:[#allocation8 + $0x2c8] sm:$0xff] }
 0x4b8   :  { %v3950_v46 = vpop.f32.mrb[15].mxu1  ;;  %1446 = vmatprep.mubr.bf16.mxu0 %v1213_v43  ;;  %v3688_v43 = vcombine.high %v1580_v35, %v1584_v36  ;;  %v1588_v45 = vld [vmem:[#allocation8 + $0x200] sm:$0xff]  ;;  %v3712_v31 = vcombine.high %v1604_v28, %v1608_v29  ;;  %v3711_v33 = vcombine.low %v1604_v28, %v1608_v29 }
 0x4b9   :  { %1447 = vmatmul.mubr.bf16.vlgmr.msra.gmra.mrb[28].mxu0 %v1212_v32  ;;  %v3673_v32 = vcombine.low %v1565_v21, %v1569_v22  ;;  %v1592_v46 = vld [vmem:[#allocation8 + $0x220] sm:$0xff]  ;;  %v1597_v22 = vld [vmem:[#allocation8 + $0x248] sm:$0xff] }
 0x4ba   :  { %2336 = vmatpush1.bf16.msra.mxu0 %v3633_v54  ;;  %2306 = vmatprep.subr.bf16.mxu1 %v3688_v43  ;;  %v3696_v50 = vcombine.high %v1588_v45, %v1592_v46  ;;  %v3695_v52 = vcombine.low %v1588_v45, %v1592_v46  ;;  %v1246_v54 = vlaneseq  ;;  %v1600_v21 = vld [vmem:[#allocation8 + $0x260] sm:$0xff] }
 0x4bb   :  { %2337 = vmatprep.subr.bf16.mxu0 %v3642_v60  ;;  %2307 = vmatpush1.bf16.msra.mxu1 %v3687_v48  ;;  %v3704_v23 = vcombine.high %v1596_v38, %v1600_v21  ;;  %v3703_v25 = vcombine.low %v1596_v38, %v1600_v21  ;;  %v1612_v36 = vld [vmem:[#allocation8 + $0x2c0] sm:$0xff]  ;;  %v4751_v38 = vld [vmem:[#allocation8 + $0x30] sm:$0xff]  ;;  %v4753_v21 = vld [vmem:[#allocation8 + $0x18] sm:$0xff] }
 0x4bc   :  { %2308 = vmatprep.subr.bf16.mxu1 %v3696_v50  ;;  %v4714_v55 = vshrl.u32 %v1246_v54, 7  ;;  %v1616_v37 = vld [vmem:[#allocation8 + $0x2e0] sm:$0xff]  ;;  %v1625_v50 = vld [vmem:[#allocation8 + $0x328] sm:$0xff] }
 0x4bd   :  { %v3720_v41 = vcombine.high %v1612_v36, %v1616_v37  ;;  %v3719_v43 = vcombine.low %v1612_v36, %v1616_v37  ;;  %v1620_v46 = vld [vmem:[#allocation8 + $0x300] sm:$0xff]  ;;  %v3730_v54 = vcombine.high %v1621_v47, %v1625_v50 }
 0x4be   :  { %2338 = vmatpush1.bf16.msra.mxu0 %v3641_v4  ;;  %v1248_v56 = vsub.s32 0, %v4714_v55  ;;  %v3727_v48 = vcombine.low %v1620_v46, %v1624_v39 }
 0x4bf   :  { %2339 = vmatprep.subr.bf16.mxu0 %v3650_v6  ;;  %2309 = vmatpush1.bf16.msra.mxu1 %v3695_v52  ;;  %v1632_v52 = vld [vmem:[#allocation8 + $0x360] sm:$0xff] }
 0x4c0   :  { %v1249_v59 = vrot.slane %v4720_v57, %v1248_v56  ;;  %v1253_v60 = vrot.slane %v4725_v58, %v1248_v56  ;;  %2310 = vmatprep.subr.bf16.mxu1 %v3704_v23  ;;  %v4757_v23 = vld [vmem:[#allocation8 + $0x38] sm:$0xff] }
 0x4c2   :  { %2340 = vmatpush1.bf16.msra.mxu0 %v3649_v11  ;;  %v4389_v11 = vld [vmem:[#allocation2 + $0x10] sm:$0xff] }
 0x4c3   :  { %2341 = vmatprep.subr.bf16.mxu0 %v3658_v13  ;;  %v4390_v13 = vld [vmem:[#allocation2 + $0x18] sm:$0xff]  ;;  %2311 = vmatpush1.bf16.msra.mxu1 %v3703_v25  ;;  %v3637_v25 = vcombine.low %v4753_v21, %v4757_v23 }
 0x4c4   :  { %2312 = vmatprep.subr.bf16.mxu1 %v3712_v31 }
 0x4c6   :  { %2342 = vmatpush1.bf16.msra.mxu0 %v3657_v15 }
 0x4c7   :  { %2343 = vmatprep.subr.bf16.mxu0 %v3666_v20  ;;  %2313 = vmatpush1.bf16.msra.mxu1 %v3711_v33 }
 0x4c8   :  { %2314 = vmatprep.subr.bf16.mxu1 %v3720_v41 }
 0x4ca   :  { %2344 = vmatpush1.bf16.msra.mxu0 %v3665_v24  ;;  %v1601_v24 = vld [vmem:[#allocation8 + $0x268] sm:$0xff] }
 0x4cb   :  { %2345 = vmatprep.subr.bf16.mxu0 %v3674_v26  ;;  %v3705_v26 = vcombine.low %v1597_v22, %v1601_v24  ;;  %v3706_v27 = vcombine.high %v1597_v22, %v1601_v24  ;;  %2315 = vmatpush1.bf16.msra.mxu1 %v3719_v43  ;;  %v1500_v43 = vsub.s32 1, %v4714_v55 }
 0x4ce   :  { %2346 = vmatpush1.bf16.msra.mxu0 %v3673_v32  ;;  %v1609_v32 = vld [vmem:[#allocation8 + $0x2a8] sm:$0xff] }
 0x4cf   :  { %2347 = vmatprep.subr.bf16.mxu0 %v3682_v34  ;;  %v3713_v34 = vcombine.low %v1605_v30, %v1609_v32  ;;  %v3714_v35 = vcombine.high %v1605_v30, %v1609_v32 }
 0x4d2   :  { %2348 = vmatpush1.bf16.msra.mxu0 %v3681_v42  ;;  %v1617_v42 = vld [vmem:[#allocation8 + $0x2e8] sm:$0xff] }
 0x4d3   :  { %2349 = vmatprep.subr.bf16.mxu0 %v3690_v44  ;;  %v3721_v44 = vcombine.low %v1613_v40, %v1617_v42  ;;  %v3722_v45 = vcombine.high %v1613_v40, %v1617_v42 }
 0x4d6   :  { %2350 = vmatpush1.bf16.msra.mxu0 %v3689_v49  ;;  %v3728_v49 = vcombine.high %v1620_v46, %v1624_v39  ;;  %v1505_v39 = vrot.slane %v4725_v58, %v1500_v43 }
 0x4d7   :  { %2351 = vmatprep.subr.bf16.mxu0 %v3698_v51  ;;  %v1628_v51 = vld [vmem:[#allocation8 + $0x340] sm:$0xff] }
 0x4d8   :  { %v3736_v56 = vcombine.high %v1628_v51, %v1632_v52  ;;  %2316 = vmatprep.subr.bf16.mxu1 %v3728_v49 }
 0x4d9   :  { %2317 = vmatpush1.bf16.msra.mxu1 %v3727_v48 }
 0x4da   :  { %2352 = vmatpush1.bf16.msra.mxu0 %v3697_v53  ;;  %v3729_v53 = vcombine.low %v1621_v47, %v1625_v50  ;;  %2318 = vmatprep.subr.bf16.mxu1 %v3736_v56  ;;  %v1501_v47 = vrot.slane %v4720_v57, %v1500_v43 }
 0x4db   :  { %2353 = vmatprep.subr.bf16.mxu0 %v3706_v27 }
 0x4de   :  { %2354 = vmatpush1.bf16.msra.mxu0 %v3705_v26  ;;  %v3638_v26 = vcombine.high %v4753_v21, %v4757_v23  ;;  %v1555_v21 = vld [vmem:[#allocation8 + $0xf8] sm:$0xff] }
 0x4df   :  { %2355 = vmatprep.subr.bf16.mxu0 %v3714_v35 }
 0x4e2   :  { %2356 = vmatpush1.bf16.msra.mxu0 %v3713_v34 }
 0x4e3   :  { %2357 = vmatprep.subr.bf16.mxu0 %v3722_v45 }
 0x4e6   :  { %2358 = vmatpush1.bf16.msra.mxu0 %v3721_v44  ;;  %v1512_v44 = vsub.s32 2, %v4714_v55 }
 0x4e7   :  { %2359 = vmatprep.subr.bf16.mxu0 %v3730_v54 }
 0x4e8   :  { %v1517_v54 = vrot.slane %v4725_v58, %v1512_v44  ;;  %v1513_v56 = vrot.slane %v4720_v57, %v1512_v44  ;;  %v1539_v58 = vld [vmem:[#allocation8 + $0x78] sm:$0xff]  ;;  %v1574_v44 = vld [vmem:[#allocation8 + $0x190] sm:$0xff] }
 0x4ea   :  { %2360 = vmatpush1.bf16.msra.mxu0 %v3729_v53 }
 0x58c   :  { %v1448_v61 = vpop.f32.mrb[28].mxu0 }
 0x58d   :  { %v1449_v62 = vadd.f32 %v1448_v61, %v1249_v59  ;;  %v1450_v0 = vpop.f32.mrb[29].mxu0 }
 0x58e   :  { %v1451_v3 = vadd.f32 %v1450_v0, %v1253_v60  ;;  %v1452_v4 = vpop.f32.mrb[30].mxu0  ;;  %v1640_v0 = vld [vmem:[#allocation8 + $0x3a0] sm:$0xff] }
 0x58f   :  { %v4729_v6 = vadd.f32 %v4387_v5, %v1449_v62  ;;  %v1453_v7 = vadd.f32 %v1452_v4, %v1249_v59  ;;  %v1454_v8 = vpop.f32.mrb[31].mxu0  ;;  %v1629_v59 = vld [vmem:[#allocation8 + $0x348] sm:$0xff]  ;;  %v1636_v62 = vld [vmem:[#allocation8 + $0x380] sm:$0xff]  ;;  %v3735_v5 = vcombine.low %v1628_v51, %v1632_v52 }
 0x590   :  { %v4731_v10 = vadd.f32 %v4388_v9, %v1451_v3  ;;  %v1455_v1 = vadd.f32 %v1454_v8, %v1253_v60  ;;  %v1633_v60 = vld [vmem:[#allocation8 + $0x368] sm:$0xff]  ;;  %v3744_v8 = vcombine.high %v1636_v62, %v1640_v0 }
 0x591   :  { %v4733_v12 = vadd.f32 %v4389_v11, %v1453_v7  ;;  %v1470_v16 = vmul.f32 %v4729_v6, %v4729_v6  ;;  %v3738_v61 = vcombine.high %v1629_v59, %v1633_v60  ;;  %v1637_v3 = vld [vmem:[#allocation8 + $0x388] sm:$0xff]  ;;  %v3737_v7 = vcombine.low %v1629_v59, %v1633_v60  ;;  %v1648_v11 = vld [vmem:[#allocation8 + $0x3e0] sm:$0xff]  ;;  %2319 = vmatpush1.bf16.msra.mxu1 %v3735_v5  ;;  %v1538_v5 = vld [vmem:[#allocation8 + $0x70] sm:$0xff] }
 0x592   :  { %v4735_v63 = vadd.f32 %v4390_v13, %v1455_v1  ;;  %v1461_v14 = vadd.f32 %v4731_v10, %v4729_v6  ;;  %v1471_v17 = vmul.f32 %v4731_v10, %v4731_v10  ;;  %v1641_v4 = vld [vmem:[#allocation8 + $0x3a8] sm:$0xff]  ;;  %v1644_v1 = vld [vmem:[#allocation8 + $0x3c0] sm:$0xff]  ;;  %2320 = vmatprep.subr.bf16.mxu1 %v3744_v8 }
 0x593   :  { %v1472_v15 = vmul.f32 %v4733_v12, %v4733_v12  ;;  %2361 = vmatprep.subr.bf16.mxu0 %v3738_v61  ;;  %v3746_v9 = vcombine.high %v1637_v3, %v1641_v4  ;;  %v1645_v13 = vld [vmem:[#allocation8 + $0x3c8] sm:$0xff] }
 0x594   :  { %1462 = vadd.xlane.f32.xlu0 %v1461_v14  ;;  %v1464_v18 = vadd.f32 %v4735_v63, %v4733_v12  ;;  %v1473_v19 = vmul.f32 %v4735_v63, %v4735_v63  ;;  %v1474_v20 = vadd.f32 %v1471_v17, %v1470_v16  ;;  %v1649_v14 = vld [vmem:[#allocation8 + $0x3e8] sm:$0xff]  ;;  %v3743_v16 = vcombine.low %v1636_v62, %v1640_v0 }
 0x595   :  { %2362 = vmatpush1.bf16.msra.mxu0 %v3737_v7  ;;  %v3745_v17 = vcombine.low %v1637_v3, %v1641_v4  ;;  %v1534_v4 = vld [vmem:[#allocation8 + $0x50] sm:$0xff]  ;;  %v1535_v7 = vld [vmem:[#allocation8 + $0x58] sm:$0xff] }
 0x596   :  { %1465 = vadd.xlane.f32.xlu1 %v1464_v18  ;;  %v1477_v2 = vadd.f32 %v1473_v19, %v1472_v15  ;;  %v3752_v18 = vcombine.high %v1644_v1, %v1648_v11  ;;  %2363 = vmatprep.subr.bf16.mxu0 %v3746_v9  ;;  %v3754_v15 = vcombine.high %v1645_v13, %v1649_v14  ;;  %v1542_v9 = vld [vmem:[#allocation8 + $0x90] sm:$0xff] }
 0x597   :  { %2321 = vmatpush1.bf16.msra.mxu1 %v3743_v16  ;;  %v3751_v19 = vcombine.low %v1644_v1, %v1648_v11  ;;  %v3644_v1 = vcombine.high %v1534_v4, %v1538_v5  ;;  %v3646_v11 = vcombine.high %v1535_v7, %v1539_v58  ;;  %v1547_v16 = vld [vmem:[#allocation8 + $0xb8] sm:$0xff] }
 0x598   :  { %1475 = vadd.xlane.f32.xlu0 %v1474_v20  ;;  %2322 = vmatprep.subr.bf16.mxu1 %v3752_v18  ;;  %v3753_v20 = vcombine.low %v1645_v13, %v1649_v14  ;;  %v1546_v13 = vld [vmem:[#allocation8 + $0xb0] sm:$0xff]  ;;  %v1543_v14 = vld [vmem:[#allocation8 + $0x98] sm:$0xff]  ;;  %v3645_v18 = vcombine.low %v1535_v7, %v1539_v58 }
 0x599   :  { %2364 = vmatpush1.bf16.msra.mxu0 %v3745_v17  ;;  %v3643_v17 = vcombine.low %v1534_v4, %v1538_v5  ;;  %v3653_v23 = vcombine.low %v1543_v14, %v1547_v16  ;;  %v1595_v4 = vld [vmem:[#allocation8 + $0x238] sm:$0xff] }
 0x59a   :  { %1478 = vadd.xlane.f32.xlu1 %v1477_v2  ;;  %2365 = vmatprep.subr.bf16.mxu0 %v3754_v15  ;;  %v4749_v2 = vld [vmem:[#allocation8 + $0x10] sm:$0xff]  ;;  %v3652_v15 = vcombine.high %v1542_v9, %v1546_v13 }
 0x59b   :  { %2323 = vmatpush1.bf16.msra.mxu1 %v3751_v19  ;;  %v3636_v22 = vcombine.high %v4749_v2, %v4751_v38  ;;  %v3635_v24 = vcombine.low %v4749_v2, %v4751_v38  ;;  %v3654_v19 = vcombine.high %v1543_v14, %v1547_v16  ;;  %v1554_v2 = vld [vmem:[#allocation8 + $0xf0] sm:$0xff]  ;;  %v1551_v38 = vld [vmem:[#allocation8 + $0xd8] sm:$0xff] }
 0x59d   :  { %2366 = vmatpush1.bf16.msra.mxu0 %v3753_v20  ;;  %2378 = vmatprep.subr.bf16.mxu1 %v3636_v22  ;;  %v1550_v20 = vld [vmem:[#allocation8 + $0xd0] sm:$0xff]  ;;  %v3651_v22 = vcombine.low %v1542_v9, %v1546_v13  ;;  %v1603_v13 = vld [vmem:[#allocation8 + $0x278] sm:$0xff] }
 0x59e   :  { %2421 = vmatprep.subr.bf16.mxu0 %v3638_v26  ;;  %v1558_v26 = vld [vmem:[#allocation8 + $0x110] sm:$0xff] }
 0x59f   :  { %v1598_v9 = vld [vmem:[#allocation8 + $0x250] sm:$0xff] }
 0x621   :  { %v1463_v27 = vpop.xlane.xlu0 %1462 }
 0x622   :  { %v1468_v28 = vmul.f32 0.00390625, %v1463_v27  ;;  %v1562_v27 = vld [vmem:[#allocation8 + $0x130] sm:$0xff] }
 0x623   :  { %v1466_v29 = vpop.xlane.xlu1 %1465 }
 0x624   :  { %v1469_v30 = vmul.f32 0.00390625, %v1466_v29  ;;  %v1482_v32 = vmul.f32 %v1468_v28, %v1468_v28  ;;  %v1486_v45 = vsub.f32 %v4729_v6, %v1468_v28  ;;  %v1487_v46 = vsub.f32 %v4731_v10, %v1468_v28  ;;  %v1559_v28 = vld [vmem:[#allocation8 + $0x118] sm:$0xff] }
 0x625   :  { %v1476_v31 = vpop.xlane.xlu0 %1475  ;;  %v1563_v29 = vld [vmem:[#allocation8 + $0x138] sm:$0xff] }
 0x626   :  { %v1480_v33 = vmul.f32 0.00390625, %v1476_v31  ;;  %v1483_v36 = vmul.f32 %v1469_v30, %v1469_v30  ;;  %v1488_v49 = vsub.f32 %v4733_v12, %v1469_v30  ;;  %v1489_v50 = vsub.f32 %v4735_v63, %v1469_v30 }
 0x627   :  { %v1479_v34 = vpop.xlane.xlu1 %1478  ;;  %v3659_v30 = vcombine.low %v1550_v20, %v1554_v2  ;;  %v3661_v31 = vcombine.low %v1551_v38, %v1555_v21 }
 0x628   :  { %v1484_v35 = vsub.f32 %v1480_v33, %v1482_v32  ;;  %v1481_v37 = vmul.f32 0.00390625, %v1479_v34  ;;  %v3668_v32 = vcombine.high %v1558_v26, %v1562_v27  ;;  %v3670_v33 = vcombine.high %v1559_v28, %v1563_v29  ;;  %v1566_v34 = vld [vmem:[#allocation8 + $0x150] sm:$0xff] }
 0x62a   :  { %v1490_v40 = vadd.f32 1e-06, %v1484_v35  ;;  %v1485_v41 = vsub.f32 %v1481_v37, %v1483_v36  ;;  %v1570_v35 = vld [vmem:[#allocation8 + $0x170] sm:$0xff]  ;;  %v1567_v36 = vld [vmem:[#allocation8 + $0x158] sm:$0xff] }
 0x62b   :  { %v1571_v37 = vld [vmem:[#allocation8 + $0x178] sm:$0xff] }
 0x62c   :  { %4379 = vrsqrt.f32 %v1490_v40  ;;  %v1491_v42 = vadd.f32 1e-06, %v1485_v41  ;;  %v3667_v40 = vcombine.low %v1558_v26, %v1562_v27  ;;  %v3669_v41 = vcombine.low %v1559_v28, %v1563_v29  ;;  %v1615_v26 = vld [vmem:[#allocation8 + $0x2d8] sm:$0xff] }
 0x62d   :  { %v3678_v43 = vcombine.high %v1567_v36, %v1571_v37  ;;  %v1619_v27 = vld [vmem:[#allocation8 + $0x2f8] sm:$0xff] }
 0x62e   :  { %4381 = vrsqrt.f32 %v1491_v42  ;;  %v3676_v42 = vcombine.high %v1566_v34, %v1570_v35 }
 0x636   :  { %v4380_v48 = vpop.eup %4379 }
 0x637   :  { %v1495_v51 = vmul.f32 %v4380_v48, %v1487_v46  ;;  %v1494_v52 = vmul.f32 %v4380_v48, %v1486_v45  ;;  %v1578_v45 = vld [vmem:[#allocation8 + $0x1b0] sm:$0xff]  ;;  %v1575_v46 = vld [vmem:[#allocation8 + $0x198] sm:$0xff]  ;;  %v3677_v48 = vcombine.low %v1567_v36, %v1571_v37  ;;  %v3725_v37 = vcombine.low %v1615_v26, %v1619_v27 }
 0x638   :  { %v4382_v53 = vpop.eup %4381 }
 0x639   :  { %v1497_v59 = vmul.f32 %v4382_v53, %v1489_v50  ;;  %v1507_v6 = vmul.f32 %v1505_v39, %v1495_v51  ;;  %v1496_v60 = vmul.f32 %v4382_v53, %v1488_v49  ;;  %v1506_v10 = vmul.f32 %v1501_v47, %v1494_v52  ;;  %v1582_v51 = vld [vmem:[#allocation8 + $0x1d0] sm:$0xff]  ;;  %v1583_v53 = vld [vmem:[#allocation8 + $0x1d8] sm:$0xff] }
 0x63a   :  { %v3684_v49 = vcombine.high %v1574_v44, %v1578_v45  ;;  %v1586_v52 = vld [vmem:[#allocation8 + $0x1f0] sm:$0xff] }
 0x63b   :  { %v1509_v61 = vmul.f32 %v1505_v39, %v1497_v59  ;;  %v1508_v62 = vmul.f32 %v1501_v47, %v1496_v60  ;;  %v4775_v0 = vadd.f32 %v1517_v54, %v1507_v6  ;;  %v4779_v12 = vadd.f32 %v1513_v56, %v1506_v10  ;;  %v1579_v39 = vld [vmem:[#allocation8 + $0x1b8] sm:$0xff]  ;;  %v1590_v10 = vld [vmem:[#allocation8 + $0x210] sm:$0xff] }
 0x63c   :  { %v3675_v47 = vcombine.low %v1566_v34, %v1570_v35  ;;  %v3686_v50 = vcombine.high %v1575_v46, %v1579_v39  ;;  %v3685_v59 = vcombine.low %v1575_v46, %v1579_v39  ;;  %v3692_v6 = vcombine.high %v1582_v51, %v1586_v52  ;;  %v1623_v34 = vld [vmem:[#allocation8 + $0x318] sm:$0xff] }
 0x63d   :  { %v4777_v3 = vadd.f32 %v1517_v54, %v1509_v61  ;;  %v4781_v63 = vadd.f32 %v1513_v56, %v1508_v62  ;;  %v1587_v54 = vld [vmem:[#allocation8 + $0x1f8] sm:$0xff]  ;;  %v3683_v56 = vcombine.low %v1574_v44, %v1578_v45  ;;  %v1594_v61 = vld [vmem:[#allocation8 + $0x230] sm:$0xff]  ;;  %v3691_v5 = vcombine.low %v1582_v51, %v1586_v52 }
 0x63e   :  { %v3694_v60 = vcombine.high %v1583_v53, %v1587_v54  ;;  %v1591_v62 = vld [vmem:[#allocation8 + $0x218] sm:$0xff]  ;;  %v3693_v7 = vcombine.low %v1583_v53, %v1587_v54  ;;  %v3700_v58 = vcombine.high %v1590_v10, %v1594_v61  ;;  %v3699_v14 = vcombine.low %v1590_v10, %v1594_v61 }
 0x63f   :  { %v1523_v57 = vpack.c.bf16 %v4777_v3, %v4775_v0  ;;  %v4787_v8 = vpack.c.bf16 %v4781_v63, %v4779_v12  ;;  %v3701_v16 = vcombine.low %v1591_v62, %v1595_v4  ;;  %v1627_v35 = vld [vmem:[#allocation8 + $0x338] sm:$0xff] }
 0x640   :  { %v1631_v44 = vld [vmem:[#allocation8 + $0x358] sm:$0xff]  ;;  %v3733_v39 = vcombine.low %v1623_v34, %v1627_v35 }
 0x641   :  { %2324 = vmatprep.mubr.bf16.mxu1 %v1523_v57  ;;  %2367 = vmatprep.mubr.bf16.mxu0 %v1523_v57  ;;  %v1635_v45 = vld [vmem:[#allocation8 + $0x378] sm:$0xff] }
 0x642   :  { %2325 = vmatmul.mubr.bf16.vlgmr.msra.gmra.mrb[16].mxu1 %v4787_v8  ;;  %2368 = vmatmul.mubr.bf16.vlgmr.msra.gmra.mrb[32].mxu0 %v4787_v8  ;;  %v1639_v51 = vld [vmem:[#allocation8 + $0x398] sm:$0xff]  ;;  %v3741_v54 = vcombine.low %v1631_v44, %v1635_v45 }
 0x643   :  { %2379 = vmatpush1.bf16.msra.mxu1 %v3635_v24  ;;  %2422 = vmatpush1.bf16.msra.mxu0 %v3637_v25  ;;  %v3660_v24 = vcombine.high %v1550_v20, %v1554_v2  ;;  %v3662_v25 = vcombine.high %v1551_v38, %v1555_v21  ;;  %v1607_v20 = vld [vmem:[#allocation8 + $0x298] sm:$0xff] }
 0x644   :  { %2410 = vmatprep.mubr.bf16.mxu1 %v1523_v57  ;;  %2453 = vmatprep.mubr.bf16.mxu0 %v1523_v57  ;;  %v3702_v57 = vcombine.high %v1591_v62, %v1595_v4  ;;  %v1611_v2 = vld [vmem:[#allocation8 + $0x2b8] sm:$0xff] }
 0x645   :  { %2380 = vmatprep.subr.bf16.mxu1 %v3644_v1  ;;  %2423 = vmatprep.subr.bf16.mxu0 %v3646_v11  ;;  %v1602_v1 = vld [vmem:[#allocation8 + $0x270] sm:$0xff]  ;;  %v1599_v11 = vld [vmem:[#allocation8 + $0x258] sm:$0xff]  ;;  %v3717_v29 = vcombine.low %v1607_v20, %v1611_v2 }
 0x646   :  { %v3707_v38 = vcombine.low %v1598_v9, %v1602_v1  ;;  %v3709_v21 = vcombine.low %v1599_v11, %v1603_v13  ;;  %v1643_v52 = vld [vmem:[#allocation8 + $0x3b8] sm:$0xff] }
 0x647   :  { %2381 = vmatpush1.bf16.msra.mxu1 %v3643_v17  ;;  %2424 = vmatpush1.bf16.msra.mxu0 %v3645_v18  ;;  %v3708_v17 = vcombine.high %v1598_v9, %v1602_v1  ;;  %v3710_v18 = vcombine.high %v1599_v11, %v1603_v13  ;;  %v1647_v10 = vld [vmem:[#allocation8 + $0x3d8] sm:$0xff]  ;;  %v3749_v4 = vcombine.low %v1639_v51, %v1643_v52  ;;  %v4173_v9 = vld [vmem:[#allocation10 + $0x4] ss:$8 sps:$4 sm:$0xff]   ;;  %v4171_v1 = vld [vmem:[#allocation10] ss:$8 sps:$4 sm:$0xff]  }
 0x648   :  { %2382 = vmatprep.subr.bf16.mxu1 %v3652_v15  ;;  %2425 = vmatprep.subr.bf16.mxu0 %v3654_v19  ;;  %v1606_v15 = vld [vmem:[#allocation8 + $0x290] sm:$0xff]  ;;  %v1651_v61 = vld [vmem:[#allocation8 + $0x3f8] sm:$0xff] }
 0x649   :  { %v1610_v19 = vld [vmem:[#allocation8 + $0x2b0] sm:$0xff] }
 0x64a   :  { %v3715_v28 = vcombine.low %v1606_v15, %v1610_v19  ;;  %v4176_v11 = vld [vmem:[#allocation10 + $0x14] ss:$8 sps:$4 sm:$0xff]   ;;  %v4174_v13 = vld [vmem:[#allocation10 + $0x10] ss:$8 sps:$4 sm:$0xff]  }
 0x64b   :  { %2383 = vmatpush1.bf16.msra.mxu1 %v3651_v22  ;;  %2426 = vmatpush1.bf16.msra.mxu0 %v3653_v23  ;;  %v3716_v22 = vcombine.high %v1606_v15, %v1610_v19  ;;  %v3718_v23 = vcombine.high %v1607_v20, %v1611_v2  ;;  %v4185_v15 = vld [vmem:[#allocation10 + $0x44] ss:$8 sps:$4 sm:$0xff]   ;;  %v4183_v19 = vld [vmem:[#allocation10 + $0x40] ss:$8 sps:$4 sm:$0xff]   ;;  %v4188_v20 = vld [vmem:[#allocation10 + $0x54] ss:$8 sps:$4 sm:$0xff]  }
 0x64c   :  { %2384 = vmatprep.subr.bf16.mxu1 %v3660_v24  ;;  %2427 = vmatprep.subr.bf16.mxu0 %v3662_v25  ;;  %v1614_v24 = vld [vmem:[#allocation8 + $0x2d0] sm:$0xff] }
 0x64d   :  { %v1618_v25 = vld [vmem:[#allocation8 + $0x2f0] sm:$0xff] }
 0x64e   :  { %v3723_v36 = vcombine.low %v1614_v24, %v1618_v25  ;;  %v4186_v2 = vld [vmem:[#allocation10 + $0x50] ss:$8 sps:$4 sm:$0xff]  }
 0x64f   :  { %2385 = vmatpush1.bf16.msra.mxu1 %v3659_v30  ;;  %2428 = vmatpush1.bf16.msra.mxu0 %v3661_v31  ;;  %v3724_v30 = vcombine.high %v1614_v24, %v1618_v25  ;;  %v3726_v31 = vcombine.high %v1615_v26, %v1619_v27  ;;  %v4195_v24 = vld [vmem:[#allocation10 + $0x80] ss:$8 sps:$4 sm:$0xff]   ;;  %v4200_v25 = vld [vmem:[#allocation10 + $0x94] ss:$8 sps:$4 sm:$0xff]   ;;  %v4198_v26 = vld [vmem:[#allocation10 + $0x90] ss:$8 sps:$4 sm:$0xff]  }
 0x650   :  { %2386 = vmatprep.subr.bf16.mxu1 %v3668_v32  ;;  %2429 = vmatprep.subr.bf16.mxu0 %v3670_v33  ;;  %v1622_v32 = vld [vmem:[#allocation8 + $0x310] sm:$0xff]  ;;  %v4203_v27 = vld [vmem:[#allocation10 + $0xa4] ss:$8 sps:$4 sm:$0xff]  }
 0x651   :  { %v1626_v33 = vld [vmem:[#allocation8 + $0x330] sm:$0xff] }
 0x652   :  { %v3731_v46 = vcombine.low %v1622_v32, %v1626_v33 }
 0x653   :  { %2387 = vmatpush1.bf16.msra.mxu1 %v3667_v40  ;;  %2430 = vmatpush1.bf16.msra.mxu0 %v3669_v41  ;;  %v3732_v40 = vcombine.high %v1622_v32, %v1626_v33  ;;  %v3734_v41 = vcombine.high %v1623_v34, %v1627_v35  ;;  %v4207_v32 = vld [vmem:[#allocation10 + $0xc0] ss:$8 sps:$4 sm:$0xff]   ;;  %v4212_v33 = vld [vmem:[#allocation10 + $0xd4] ss:$8 sps:$4 sm:$0xff]   ;;  %v4210_v34 = vld [vmem:[#allocation10 + $0xd0] ss:$8 sps:$4 sm:$0xff]  }
 0x654   :  { %2388 = vmatprep.subr.bf16.mxu1 %v3676_v42  ;;  %2431 = vmatprep.subr.bf16.mxu0 %v3678_v43  ;;  %v1630_v42 = vld [vmem:[#allocation8 + $0x350] sm:$0xff]  ;;  %v4215_v35 = vld [vmem:[#allocation10 + $0xe4] ss:$8 sps:$4 sm:$0xff]  }
 0x655   :  { %v1634_v43 = vld [vmem:[#allocation8 + $0x370] sm:$0xff] }
 0x656   :  { %v3739_v53 = vcombine.low %v1630_v42, %v1634_v43 }
 0x657   :  { %2389 = vmatpush1.bf16.msra.mxu1 %v3675_v47  ;;  %2432 = vmatpush1.bf16.msra.mxu0 %v3677_v48  ;;  %v3740_v47 = vcombine.high %v1630_v42, %v1634_v43  ;;  %v3742_v48 = vcombine.high %v1631_v44, %v1635_v45 }
 0x658   :  { %2390 = vmatprep.subr.bf16.mxu1 %v3684_v49  ;;  %2433 = vmatprep.subr.bf16.mxu0 %v3686_v50  ;;  %v1638_v49 = vld [vmem:[#allocation8 + $0x390] sm:$0xff] }
 0x659   :  { %v1642_v50 = vld [vmem:[#allocation8 + $0x3b0] sm:$0xff] }
 0x65a   :  { %v3747_v62 = vcombine.low %v1638_v49, %v1642_v50 }
 0x65b   :  { %2391 = vmatpush1.bf16.msra.mxu1 %v3683_v56  ;;  %2434 = vmatpush1.bf16.msra.mxu0 %v3685_v59  ;;  %v3748_v56 = vcombine.high %v1638_v49, %v1642_v50  ;;  %v3750_v59 = vcombine.high %v1639_v51, %v1643_v52 }
 0x65c   :  { %2392 = vmatprep.subr.bf16.mxu1 %v3692_v6  ;;  %2435 = vmatprep.subr.bf16.mxu0 %v3694_v60  ;;  %v1646_v6 = vld [vmem:[#allocation8 + $0x3d0] sm:$0xff] }
 0x65d   :  { %v1650_v60 = vld [vmem:[#allocation8 + $0x3f0] sm:$0xff] }
 0x65f   :  { %2393 = vmatpush1.bf16.msra.mxu1 %v3691_v5  ;;  %2436 = vmatpush1.bf16.msra.mxu0 %v3693_v7  ;;  %v3756_v5 = vcombine.high %v1646_v6, %v1650_v60  ;;  %v3758_v7 = vcombine.high %v1647_v10, %v1651_v61 }
 0x660   :  { %2394 = vmatprep.subr.bf16.mxu1 %v3700_v58  ;;  %2437 = vmatprep.subr.bf16.mxu0 %v3702_v57  ;;  %v3755_v58 = vcombine.low %v1646_v6, %v1650_v60  ;;  %v3757_v57 = vcombine.low %v1647_v10, %v1651_v61  ;;  %v4225_v6 = vld [vmem:[#allocation10 + $0x120] ss:$8 sps:$4 sm:$0xff]   ;;  %v4230_v60 = vld [vmem:[#allocation10 + $0x134] ss:$8 sps:$4 sm:$0xff]   ;;  %v4228_v10 = vld [vmem:[#allocation10 + $0x130] ss:$8 sps:$4 sm:$0xff]  }
 0x661   :  { %v4233_v61 = vld [vmem:[#allocation10 + $0x144] ss:$8 sps:$4 sm:$0xff]  }
 0x663   :  { %2395 = vmatpush1.bf16.msra.mxu1 %v3699_v14  ;;  %2438 = vmatpush1.bf16.msra.mxu0 %v3701_v16  ;;  %v4179_v14 = vld [vmem:[#allocation10 + $0x24] ss:$8 sps:$4 sm:$0xff]   ;;  %v4177_v16 = vld [vmem:[#allocation10 + $0x20] ss:$8 sps:$4 sm:$0xff]  }
 0x664   :  { %2396 = vmatprep.subr.bf16.mxu1 %v3708_v17  ;;  %2439 = vmatprep.subr.bf16.mxu0 %v3710_v18  ;;  %v4182_v17 = vld [vmem:[#allocation10 + $0x34] ss:$8 sps:$4 sm:$0xff]   ;;  %v4180_v18 = vld [vmem:[#allocation10 + $0x30] ss:$8 sps:$4 sm:$0xff]  }
 0x667   :  { %2397 = vmatpush1.bf16.msra.mxu1 %v3707_v38  ;;  %2440 = vmatpush1.bf16.msra.mxu0 %v3709_v21  ;;  %v4189_v38 = vld [vmem:[#allocation10 + $0x60] ss:$8 sps:$4 sm:$0xff]   ;;  %v4194_v21 = vld [vmem:[#allocation10 + $0x74] ss:$8 sps:$4 sm:$0xff]  }
 0x668   :  { %2398 = vmatprep.subr.bf16.mxu1 %v3716_v22  ;;  %2441 = vmatprep.subr.bf16.mxu0 %v3718_v23  ;;  %v4192_v22 = vld [vmem:[#allocation10 + $0x70] ss:$8 sps:$4 sm:$0xff]   ;;  %v4197_v23 = vld [vmem:[#allocation10 + $0x84] ss:$8 sps:$4 sm:$0xff]  }
 0x66b   :  { %2399 = vmatpush1.bf16.msra.mxu1 %v3715_v28  ;;  %2442 = vmatpush1.bf16.msra.mxu0 %v3717_v29  ;;  %v4201_v28 = vld [vmem:[#allocation10 + $0xa0] ss:$8 sps:$4 sm:$0xff]   ;;  %v4206_v29 = vld [vmem:[#allocation10 + $0xb4] ss:$8 sps:$4 sm:$0xff]  }
 0x66c   :  { %2400 = vmatprep.subr.bf16.mxu1 %v3724_v30  ;;  %2443 = vmatprep.subr.bf16.mxu0 %v3726_v31  ;;  %v4204_v30 = vld [vmem:[#allocation10 + $0xb0] ss:$8 sps:$4 sm:$0xff]   ;;  %v4209_v31 = vld [vmem:[#allocation10 + $0xc4] ss:$8 sps:$4 sm:$0xff]  }
 0x66f   :  { %2401 = vmatpush1.bf16.msra.mxu1 %v3723_v36  ;;  %2444 = vmatpush1.bf16.msra.mxu0 %v3725_v37  ;;  %v4213_v36 = vld [vmem:[#allocation10 + $0xe0] ss:$8 sps:$4 sm:$0xff]   ;;  %v4218_v37 = vld [vmem:[#allocation10 + $0xf4] ss:$8 sps:$4 sm:$0xff]  }
 0x670   :  { %2402 = vmatprep.subr.bf16.mxu1 %v3732_v40  ;;  %2445 = vmatprep.subr.bf16.mxu0 %v3734_v41  ;;  %v4216_v40 = vld [vmem:[#allocation10 + $0xf0] ss:$8 sps:$4 sm:$0xff]   ;;  %v4221_v41 = vld [vmem:[#allocation10 + $0x104] ss:$8 sps:$4 sm:$0xff]  }
 0x673   :  { %2403 = vmatpush1.bf16.msra.mxu1 %v3731_v46  ;;  %2446 = vmatpush1.bf16.msra.mxu0 %v3733_v39 }
 0x674   :  { %2404 = vmatprep.subr.bf16.mxu1 %v3740_v47  ;;  %2447 = vmatprep.subr.bf16.mxu0 %v3742_v48 }
 0x677   :  { %2405 = vmatpush1.bf16.msra.mxu1 %v3739_v53  ;;  %2448 = vmatpush1.bf16.msra.mxu0 %v3741_v54  ;;  %v4219_v53 = vld [vmem:[#allocation10 + $0x100] ss:$8 sps:$4 sm:$0xff]   ;;  %v4224_v54 = vld [vmem:[#allocation10 + $0x114] ss:$8 sps:$4 sm:$0xff]  }
 0x678   :  { %2406 = vmatprep.subr.bf16.mxu1 %v3748_v56  ;;  %2449 = vmatprep.subr.bf16.mxu0 %v3750_v59  ;;  %v4222_v56 = vld [vmem:[#allocation10 + $0x110] ss:$8 sps:$4 sm:$0xff]   ;;  %v4227_v59 = vld [vmem:[#allocation10 + $0x124] ss:$8 sps:$4 sm:$0xff]  }
 0x67b   :  { %2407 = vmatpush1.bf16.msra.mxu1 %v3747_v62  ;;  %2450 = vmatpush1.bf16.msra.mxu0 %v3749_v4  ;;  %v4231_v62 = vld [vmem:[#allocation10 + $0x140] ss:$8 sps:$4 sm:$0xff]   ;;  %v4236_v4 = vld [vmem:[#allocation10 + $0x154] ss:$8 sps:$4 sm:$0xff]  }
 0x67c   :  { %2408 = vmatprep.subr.bf16.mxu1 %v3756_v5  ;;  %2451 = vmatprep.subr.bf16.mxu0 %v3758_v7  ;;  %v4234_v5 = vld [vmem:[#allocation10 + $0x150] ss:$8 sps:$4 sm:$0xff]   ;;  %v4239_v7 = vld [vmem:[#allocation10 + $0x164] ss:$8 sps:$4 sm:$0xff]  }
 0x67f   :  { %2409 = vmatpush1.bf16.msra.mxu1 %v3755_v58  ;;  %2452 = vmatpush1.bf16.msra.mxu0 %v3757_v57  ;;  %v4237_v58 = vld [vmem:[#allocation10 + $0x160] ss:$8 sps:$4 sm:$0xff]   ;;  %v4242_v57 = vld [vmem:[#allocation10 + $0x174] ss:$8 sps:$4 sm:$0xff]  }
 0x680   :  { %3240 = vmatprep.subr.bf16.mxu1 %v4173_v9  ;;  %v4240_v9 = vld [vmem:[#allocation10 + $0x170] ss:$8 sps:$4 sm:$0xff]  }
 0x682   :  { %2411 = vmatmul.mubr.bf16.vlgmr.msra.gmra.mrb[20].mxu1 %v4787_v8  ;;  %2454 = vmatmul.mubr.bf16.vlgmr.msra.gmra.mrb[36].mxu0 %v4787_v8  ;;  %v4191_v8 = vld [vmem:[#allocation10 + $0x64] ss:$8 sps:$4 sm:$0xff]  }
 0x683   :  { %3241 = vmatpush1.bf16.msra.mxu1 %v4171_v1  ;;  %v4245_v1 = vld [vmem:[#allocation10 + $0x184] ss:$8 sps:$4 sm:$0xff]  }
 0x684   :  { %3242 = vmatprep.subr.bf16.mxu1 %v4176_v11  ;;  %v4243_v11 = vld [vmem:[#allocation10 + $0x180] ss:$8 sps:$4 sm:$0xff]  }
 0x687   :  { %3243 = vmatpush1.bf16.msra.mxu1 %v4174_v13  ;;  %v4248_v13 = vld [vmem:[#allocation10 + $0x194] ss:$8 sps:$4 sm:$0xff]  }
 0x688   :  { %3244 = vmatprep.subr.bf16.mxu1 %v4179_v14  ;;  %v4246_v14 = vld [vmem:[#allocation10 + $0x190] ss:$8 sps:$4 sm:$0xff]  }
 0x68b   :  { %3245 = vmatpush1.bf16.msra.mxu1 %v4177_v16  ;;  %v4251_v16 = vld [vmem:[#allocation10 + $0x1a4] ss:$8 sps:$4 sm:$0xff]  }
 0x68c   :  { %3246 = vmatprep.subr.bf16.mxu1 %v4182_v17  ;;  %v4249_v17 = vld [vmem:[#allocation10 + $0x1a0] ss:$8 sps:$4 sm:$0xff]  }
 0x68f   :  { %3247 = vmatpush1.bf16.msra.mxu1 %v4180_v18  ;;  %v4254_v18 = vld [vmem:[#allocation10 + $0x1b4] ss:$8 sps:$4 sm:$0xff]  }
 0x690   :  { %3248 = vmatprep.subr.bf16.mxu1 %v4185_v15  ;;  %v4252_v15 = vld [vmem:[#allocation10 + $0x1b0] ss:$8 sps:$4 sm:$0xff]  }
 0x693   :  { %3249 = vmatpush1.bf16.msra.mxu1 %v4183_v19  ;;  %v4257_v19 = vld [vmem:[#allocation10 + $0x1c4] ss:$8 sps:$4 sm:$0xff]  }
 0x694   :  { %3250 = vmatprep.subr.bf16.mxu1 %v4188_v20  ;;  %v4255_v20 = vld [vmem:[#allocation10 + $0x1c0] ss:$8 sps:$4 sm:$0xff]  }
 0x697   :  { %3251 = vmatpush1.bf16.msra.mxu1 %v4186_v2  ;;  %v4260_v2 = vld [vmem:[#allocation10 + $0x1d4] ss:$8 sps:$4 sm:$0xff]  }
 0x698   :  { %3252 = vmatprep.subr.bf16.mxu1 %v4191_v8  ;;  %v4258_v8 = vld [vmem:[#allocation10 + $0x1d0] ss:$8 sps:$4 sm:$0xff]  }
 0x69b   :  { %3253 = vmatpush1.bf16.msra.mxu1 %v4189_v38  ;;  %v4263_v38 = vld [vmem:[#allocation10 + $0x1e4] ss:$8 sps:$4 sm:$0xff]  }
 0x69c   :  { %3254 = vmatprep.subr.bf16.mxu1 %v4194_v21  ;;  %v4261_v21 = vld [vmem:[#allocation10 + $0x1e0] ss:$8 sps:$4 sm:$0xff]  }
 0x69f   :  { %3255 = vmatpush1.bf16.msra.mxu1 %v4192_v22  ;;  %v4266_v22 = vld [vmem:[#allocation10 + $0x1f4] ss:$8 sps:$4 sm:$0xff]  }
 0x6a0   :  { %3256 = vmatprep.subr.bf16.mxu1 %v4197_v23 }
 0x6a3   :  { %3257 = vmatpush1.bf16.msra.mxu1 %v4195_v24 }
 0x6a4   :  { %3258 = vmatprep.subr.bf16.mxu1 %v4200_v25  ;;  %v4264_v25 = vld [vmem:[#allocation10 + $0x1f0] ss:$8 sps:$4 sm:$0xff]  }
 0x6a7   :  { %3259 = vmatpush1.bf16.msra.mxu1 %v4198_v26 }
 0x6a8   :  { %3260 = vmatprep.subr.bf16.mxu1 %v4203_v27 }
 0x6ab   :  { %3261 = vmatpush1.bf16.msra.mxu1 %v4201_v28  ;;  %v4269_v28 = vld [vmem:[#allocation10 + $0x204] ss:$8 sps:$4 sm:$0xff]  }
 0x6ac   :  { %3262 = vmatprep.subr.bf16.mxu1 %v4206_v29 }
 0x6af   :  { %3263 = vmatpush1.bf16.msra.mxu1 %v4204_v30 }
 0x6b0   :  { %3264 = vmatprep.subr.bf16.mxu1 %v4209_v31 }
 0x6b3   :  { %3265 = vmatpush1.bf16.msra.mxu1 %v4207_v32 }
 0x6b4   :  { %3266 = vmatprep.subr.bf16.mxu1 %v4212_v33 }
 0x6b7   :  { %3267 = vmatpush1.bf16.msra.mxu1 %v4210_v34 }
 0x6b8   :  { %3268 = vmatprep.subr.bf16.mxu1 %v4215_v35 }
 0x6bb   :  { %3269 = vmatpush1.bf16.msra.mxu1 %v4213_v36 }
 0x6bc   :  { %3270 = vmatprep.subr.bf16.mxu1 %v4218_v37  ;;  %v4267_v37 = vld [vmem:[#allocation10 + $0x200] ss:$8 sps:$4 sm:$0xff]  }
 0x6bf   :  { %3271 = vmatpush1.bf16.msra.mxu1 %v4216_v40  ;;  %v4272_v40 = vld [vmem:[#allocation10 + $0x214] ss:$8 sps:$4 sm:$0xff]  }
 0x6c0   :  { %3283 = vmatprep.subr.bf16.mxu1 %v4221_v41  ;;  %v4270_v41 = vld [vmem:[#allocation10 + $0x210] ss:$8 sps:$4 sm:$0xff]  }
 0x715   :  { %v2326_v42 = vpop.f32.mrb[16].mxu1  ;;  %v4793_v43 = vpop.f32.mrb[32].mxu0 }
 0x716   :  { %v2328_v44 = vpop.f32.mrb[17].mxu1  ;;  %v2371_v45 = vpop.f32.mrb[33].mxu0 }
 0x717   :  { %v2330_v46 = vpop.f32.mrb[18].mxu1  ;;  %v4795_v39 = vpop.f32.mrb[34].mxu0 }
 0x718   :  { %v2464_v47 = vpack.c.bf16 %v2330_v46, %v2326_v42  ;;  %v2466_v48 = vpack.c.bf16 %v4795_v39, %v4793_v43  ;;  %v2332_v49 = vpop.f32.mrb[19].mxu1  ;;  %v2375_v50 = vpop.f32.mrb[35].mxu0  ;;  %v4275_v42 = vld [vmem:[#allocation10 + $0x224] ss:$8 sps:$4 sm:$0xff]   ;;  %v4276_v46 = vld [vmem:[#allocation10 + $0x230] ss:$8 sps:$4 sm:$0xff]  }
 0x719   :  { %v2465_v51 = vpack.c.bf16 %v2332_v49, %v2328_v44  ;;  %v2467_v52 = vpack.c.bf16 %v2375_v50, %v2371_v45  ;;  %v4273_v44 = vld [vmem:[#allocation10 + $0x220] ss:$8 sps:$4 sm:$0xff]   ;;  %v4278_v45 = vld [vmem:[#allocation10 + $0x234] ss:$8 sps:$4 sm:$0xff]   ;;  %v4282_v43 = vld [vmem:[#allocation10 + $0x250] ss:$8 sps:$4 sm:$0xff]  }
 0x71a   :  { %v4279_v49 = vld [vmem:[#allocation10 + $0x240] ss:$8 sps:$4 sm:$0xff]   ;;  %v4284_v50 = vld [vmem:[#allocation10 + $0x254] ss:$8 sps:$4 sm:$0xff]   ;;  %v4287_v39 = vld [vmem:[#allocation10 + $0x264] ss:$8 sps:$4 sm:$0xff]  }
 0x71b   :  { %3272 = vmatprep.mubr.bf16.mxu1 %v2465_v51  ;;  %v4290_v51 = vld [vmem:[#allocation10 + $0x274] ss:$8 sps:$4 sm:$0xff]  }
 0x71c   :  { %3273 = vmatmul.mubr.bf16.vlgmr.msra.gmra.mrb[24].mxu1 %v2464_v47  ;;  %v4281_v47 = vld [vmem:[#allocation10 + $0x244] ss:$8 sps:$4 sm:$0xff]  }
 0x71d   :  { %3284 = vmatpush1.bf16.msra.mxu1 %v4219_v53  ;;  %3315 = vmatprep.mubr.bf16.mxu1 %v2467_v52  ;;  %v4288_v52 = vld [vmem:[#allocation10 + $0x270] ss:$8 sps:$4 sm:$0xff]   ;;  %v4293_v53 = vld [vmem:[#allocation10 + $0x284] ss:$8 sps:$4 sm:$0xff]  }
 0x71e   :  { %3285 = vmatprep.subr.bf16.mxu1 %v4224_v54  ;;  %v4291_v54 = vld [vmem:[#allocation10 + $0x280] ss:$8 sps:$4 sm:$0xff]  }
 0x721   :  { %3286 = vmatpush1.bf16.msra.mxu1 %v4222_v56  ;;  %v4296_v56 = vld [vmem:[#allocation10 + $0x294] ss:$8 sps:$4 sm:$0xff]  }
 0x722   :  { %3287 = vmatprep.subr.bf16.mxu1 %v4227_v59  ;;  %v4294_v59 = vld [vmem:[#allocation10 + $0x290] ss:$8 sps:$4 sm:$0xff]  }
 0x725   :  { %3288 = vmatpush1.bf16.msra.mxu1 %v4225_v6  ;;  %v4299_v6 = vld [vmem:[#allocation10 + $0x2a4] ss:$8 sps:$4 sm:$0xff]  }
 0x726   :  { %3289 = vmatprep.subr.bf16.mxu1 %v4230_v60  ;;  %v4297_v60 = vld [vmem:[#allocation10 + $0x2a0] ss:$8 sps:$4 sm:$0xff]  }
 0x729   :  { %3290 = vmatpush1.bf16.msra.mxu1 %v4228_v10  ;;  %v4302_v10 = vld [vmem:[#allocation10 + $0x2b4] ss:$8 sps:$4 sm:$0xff]  }
 0x72a   :  { %3291 = vmatprep.subr.bf16.mxu1 %v4233_v61  ;;  %v4300_v61 = vld [vmem:[#allocation10 + $0x2b0] ss:$8 sps:$4 sm:$0xff]  }
 0x72d   :  { %3292 = vmatpush1.bf16.msra.mxu1 %v4231_v62  ;;  %v4305_v62 = vld [vmem:[#allocation10 + $0x2c4] ss:$8 sps:$4 sm:$0xff]  }
 0x72e   :  { %3293 = vmatprep.subr.bf16.mxu1 %v4236_v4  ;;  %v4303_v4 = vld [vmem:[#allocation10 + $0x2c0] ss:$8 sps:$4 sm:$0xff]  }
 0x731   :  { %3294 = vmatpush1.bf16.msra.mxu1 %v4234_v5  ;;  %v4308_v5 = vld [vmem:[#allocation10 + $0x2d4] ss:$8 sps:$4 sm:$0xff]  }
 0x732   :  { %3295 = vmatprep.subr.bf16.mxu1 %v4239_v7  ;;  %v4306_v7 = vld [vmem:[#allocation10 + $0x2d0] ss:$8 sps:$4 sm:$0xff]  }
 0x735   :  { %3296 = vmatpush1.bf16.msra.mxu1 %v4237_v58  ;;  %v4311_v58 = vld [vmem:[#allocation10 + $0x2e4] ss:$8 sps:$4 sm:$0xff]  }
 0x736   :  { %3297 = vmatprep.subr.bf16.mxu1 %v4242_v57  ;;  %v4309_v57 = vld [vmem:[#allocation10 + $0x2e0] ss:$8 sps:$4 sm:$0xff]  }
 0x739   :  { %3298 = vmatpush1.bf16.msra.mxu1 %v4240_v9  ;;  %v4314_v9 = vld [vmem:[#allocation10 + $0x2f4] ss:$8 sps:$4 sm:$0xff]  }
 0x73a   :  { %3299 = vmatprep.subr.bf16.mxu1 %v4245_v1  ;;  %v4312_v1 = vld [vmem:[#allocation10 + $0x2f0] ss:$8 sps:$4 sm:$0xff]  }
 0x73d   :  { %3300 = vmatpush1.bf16.msra.mxu1 %v4243_v11  ;;  %v4317_v11 = vld [vmem:[#allocation10 + $0x304] ss:$8 sps:$4 sm:$0xff]  }
 0x73e   :  { %3301 = vmatprep.subr.bf16.mxu1 %v4248_v13  ;;  %v4315_v13 = vld [vmem:[#allocation10 + $0x300] ss:$8 sps:$4 sm:$0xff]  }
 0x741   :  { %3302 = vmatpush1.bf16.msra.mxu1 %v4246_v14  ;;  %v4320_v14 = vld [vmem:[#allocation10 + $0x314] ss:$8 sps:$4 sm:$0xff]  }
 0x742   :  { %3303 = vmatprep.subr.bf16.mxu1 %v4251_v16  ;;  %v4318_v16 = vld [vmem:[#allocation10 + $0x310] ss:$8 sps:$4 sm:$0xff]  }
 0x745   :  { %3304 = vmatpush1.bf16.msra.mxu1 %v4249_v17  ;;  %v4323_v17 = vld [vmem:[#allocation10 + $0x324] ss:$8 sps:$4 sm:$0xff]  }
 0x746   :  { %3305 = vmatprep.subr.bf16.mxu1 %v4254_v18  ;;  %v4321_v18 = vld [vmem:[#allocation10 + $0x320] ss:$8 sps:$4 sm:$0xff]  }
 0x749   :  { %3306 = vmatpush1.bf16.msra.mxu1 %v4252_v15  ;;  %v4326_v15 = vld [vmem:[#allocation10 + $0x334] ss:$8 sps:$4 sm:$0xff]  }
 0x74a   :  { %3307 = vmatprep.subr.bf16.mxu1 %v4257_v19  ;;  %v4324_v19 = vld [vmem:[#allocation10 + $0x330] ss:$8 sps:$4 sm:$0xff]  }
 0x74d   :  { %3308 = vmatpush1.bf16.msra.mxu1 %v4255_v20  ;;  %v4329_v20 = vld [vmem:[#allocation10 + $0x344] ss:$8 sps:$4 sm:$0xff]  }
 0x74e   :  { %3309 = vmatprep.subr.bf16.mxu1 %v4260_v2  ;;  %v4327_v2 = vld [vmem:[#allocation10 + $0x340] ss:$8 sps:$4 sm:$0xff]  }
 0x751   :  { %3310 = vmatpush1.bf16.msra.mxu1 %v4258_v8  ;;  %v4332_v8 = vld [vmem:[#allocation10 + $0x354] ss:$8 sps:$4 sm:$0xff]  }
 0x752   :  { %3311 = vmatprep.subr.bf16.mxu1 %v4263_v38  ;;  %v4330_v38 = vld [vmem:[#allocation10 + $0x350] ss:$8 sps:$4 sm:$0xff]  }
 0x755   :  { %v4799_v23 = vpop.f32.mrb[20].mxu1  ;;  %v4801_v24 = vpop.f32.mrb[36].mxu0  ;;  %3312 = vmatpush1.bf16.msra.mxu1 %v4261_v21  ;;  %v4335_v21 = vld [vmem:[#allocation10 + $0x364] ss:$8 sps:$4 sm:$0xff]  }
 0x756   :  { %v2414_v26 = vpop.f32.mrb[21].mxu1  ;;  %v4803_v27 = vpop.f32.mrb[37].mxu0  ;;  %3313 = vmatprep.subr.bf16.mxu1 %v4266_v22  ;;  %v4333_v22 = vld [vmem:[#allocation10 + $0x360] ss:$8 sps:$4 sm:$0xff]  }
 0x757   :  { %v4805_v29 = vpop.f32.mrb[22].mxu1  ;;  %v4807_v30 = vpop.f32.mrb[38].mxu0 }
 0x758   :  { %v2468_v31 = vpack.c.bf16 %v4805_v29, %v4799_v23  ;;  %v2470_v32 = vpack.c.bf16 %v4807_v30, %v4801_v24  ;;  %v2418_v33 = vpop.f32.mrb[23].mxu1  ;;  %v4813_v34 = vpop.f32.mrb[39].mxu0  ;;  %v4338_v23 = vld [vmem:[#allocation10 + $0x374] ss:$8 sps:$4 sm:$0xff]   ;;  %v4342_v29 = vld [vmem:[#allocation10 + $0x390] ss:$8 sps:$4 sm:$0xff]  }
 0x759   :  { %v2469_v35 = vpack.c.bf16 %v2418_v33, %v2414_v26  ;;  %v2471_v36 = vpack.c.bf16 %v4813_v34, %v4803_v27  ;;  %3314 = vmatpush1.bf16.msra.mxu1 %v4264_v25  ;;  %v4336_v25 = vld [vmem:[#allocation10 + $0x370] ss:$8 sps:$4 sm:$0xff]   ;;  %v4341_v26 = vld [vmem:[#allocation10 + $0x384] ss:$8 sps:$4 sm:$0xff]   ;;  %v4339_v27 = vld [vmem:[#allocation10 + $0x380] ss:$8 sps:$4 sm:$0xff]  }
 0x75a   :  { %3326 = vmatprep.subr.bf16.mxu1 %v4269_v28  ;;  %v4344_v28 = vld [vmem:[#allocation10 + $0x394] ss:$8 sps:$4 sm:$0xff]   ;;  %v4345_v33 = vld [vmem:[#allocation10 + $0x3a0] ss:$8 sps:$4 sm:$0xff]  }
 0x75b   :  { %v4350_v34 = vld [vmem:[#allocation10 + $0x3b4] ss:$8 sps:$4 sm:$0xff]  }
 0x75c   :  { %3316 = vmatmul.mubr.bf16.vlgmr.msra.gmra.mrb[24].mxu1 %v2466_v48  ;;  %v4285_v48 = vld [vmem:[#allocation10 + $0x260] ss:$8 sps:$4 sm:$0xff]  }
 0x75d   :  { %3327 = vmatpush1.bf16.msra.mxu1 %v4267_v37  ;;  %3358 = vmatprep.mubr.bf16.mxu1 %v2469_v35  ;;  %v4348_v35 = vld [vmem:[#allocation10 + $0x3b0] ss:$8 sps:$4 sm:$0xff]   ;;  %v4351_v37 = vld [vmem:[#allocation10 + $0x3c0] ss:$8 sps:$4 sm:$0xff]  }
 0x75e   :  { %3328 = vmatprep.subr.bf16.mxu1 %v4272_v40  ;;  %v4356_v40 = vld [vmem:[#allocation10 + $0x3d4] ss:$8 sps:$4 sm:$0xff]  }
 0x761   :  { %3329 = vmatpush1.bf16.msra.mxu1 %v4270_v41  ;;  %v4354_v41 = vld [vmem:[#allocation10 + $0x3d0] ss:$8 sps:$4 sm:$0xff]  }
 0x762   :  { %3330 = vmatprep.subr.bf16.mxu1 %v4275_v42  ;;  %v4359_v42 = vld [vmem:[#allocation10 + $0x3e4] ss:$8 sps:$4 sm:$0xff]  }
 0x765   :  { %3331 = vmatpush1.bf16.msra.mxu1 %v4273_v44  ;;  %v4357_v44 = vld [vmem:[#allocation10 + $0x3e0] ss:$8 sps:$4 sm:$0xff]  }
 0x766   :  { %3332 = vmatprep.subr.bf16.mxu1 %v4278_v45  ;;  %v4362_v45 = vld [vmem:[#allocation10 + $0x3f4] ss:$8 sps:$4 sm:$0xff]  }
 0x769   :  { %3333 = vmatpush1.bf16.msra.mxu1 %v4276_v46  ;;  %v4360_v46 = vld [vmem:[#allocation10 + $0x3f0] ss:$8 sps:$4 sm:$0xff]  }
 0x76a   :  { %3334 = vmatprep.subr.bf16.mxu1 %v4281_v47 }
 0x76d   :  { %3335 = vmatpush1.bf16.msra.mxu1 %v4279_v49 }
 0x76e   :  { %3336 = vmatprep.subr.bf16.mxu1 %v4284_v50 }
 0x771   :  { %3337 = vmatpush1.bf16.msra.mxu1 %v4282_v43 }
 0x772   :  { %3338 = vmatprep.subr.bf16.mxu1 %v4287_v39 }
 0x775   :  { %3339 = vmatpush1.bf16.msra.mxu1 %v4285_v48 }
 0x776   :  { %3340 = vmatprep.subr.bf16.mxu1 %v4290_v51 }
 0x779   :  { %3341 = vmatpush1.bf16.msra.mxu1 %v4288_v52 }
 0x77a   :  { %3342 = vmatprep.subr.bf16.mxu1 %v4293_v53 }
 0x77d   :  { %3343 = vmatpush1.bf16.msra.mxu1 %v4291_v54 }
 0x77e   :  { %3344 = vmatprep.subr.bf16.mxu1 %v4296_v56 }
 0x781   :  { %3345 = vmatpush1.bf16.msra.mxu1 %v4294_v59 }
 0x782   :  { %3346 = vmatprep.subr.bf16.mxu1 %v4299_v6 }
 0x785   :  { %3347 = vmatpush1.bf16.msra.mxu1 %v4297_v60 }
 0x786   :  { %3348 = vmatprep.subr.bf16.mxu1 %v4302_v10 }
 0x789   :  { %3349 = vmatpush1.bf16.msra.mxu1 %v4300_v61 }
 0x78a   :  { %3350 = vmatprep.subr.bf16.mxu1 %v4305_v62 }
 0x78d   :  { %3351 = vmatpush1.bf16.msra.mxu1 %v4303_v4 }
 0x78e   :  { %3352 = vmatprep.subr.bf16.mxu1 %v4308_v5 }
 0x791   :  { %3353 = vmatpush1.bf16.msra.mxu1 %v4306_v7 }
 0x792   :  { %3354 = vmatprep.subr.bf16.mxu1 %v4311_v58 }
 0x795   :  { %3355 = vmatpush1.bf16.msra.mxu1 %v4309_v57 }
 0x796   :  { %3356 = vmatprep.subr.bf16.mxu1 %v4314_v9 }
 0x799   :  { %3357 = vmatpush1.bf16.msra.mxu1 %v4312_v1  ;;  %v3454_v1 = vsub.s32 3, %v4714_v55 }
 0x79a   :  { %3369 = vmatprep.subr.bf16.mxu1 %v4317_v11  ;;  %v3466_v11 = vsub.s32 4, %v4714_v55 }
 0x79c   :  { %3359 = vmatmul.mubr.bf16.vlgmr.msra.gmra.mrb[24].mxu1 %v2468_v31  ;;  %v4347_v31 = vld [vmem:[#allocation10 + $0x3a4] ss:$8 sps:$4 sm:$0xff]  }
 0x79d   :  { %3370 = vmatpush1.bf16.msra.mxu1 %v4315_v13  ;;  %3401 = vmatprep.mubr.bf16.mxu1 %v2471_v36  ;;  %v4353_v36 = vld [vmem:[#allocation10 + $0x3c4] ss:$8 sps:$4 sm:$0xff]  }
 0x79e   :  { %3371 = vmatprep.subr.bf16.mxu1 %v4320_v14 }
 0x7a1   :  { %3372 = vmatpush1.bf16.msra.mxu1 %v4318_v16  ;;  %v4391_v16 = vld [vmem:[%s4861_s5] sm:$0xff] }
 0x7a2   :  { %3373 = vmatprep.subr.bf16.mxu1 %v4323_v17  ;;  %v3455_v17 = vrot.slane %v4391_v16, %v3454_v1 }
 0x7a5   :  { %3374 = vmatpush1.bf16.msra.mxu1 %v4321_v18  ;;  %v4392_v18 = vld [vmem:[%s4861_s5 + $0x8] sm:$0xff]  ;;  %s4503_s5 = scalar_lea.vmem %s3486_s1, 512 }
 0x7a6   :  { %3375 = vmatprep.subr.bf16.mxu1 %v4326_v15  ;;  %v3459_v15 = vrot.slane %v4392_v18, %v3454_v1  ;;  %p4504_p12 = scmp.ne.s32.totalorder %s3486_s1, %s4503_s5  ;;  %p4509_p0 = scmp.lt.s32.totalorder %s4503_s5, %s4503_s5 }
 0x7a8   :  { %p4510_p1 = por %p4509_p0, %p4508_p13 }
 0x7a9   :  { %3376 = vmatpush1.bf16.msra.mxu1 %v4324_v19 }
 0x7aa   :  { %3377 = vmatprep.subr.bf16.mxu1 %v4329_v20  ;;  %v3467_v20 = vrot.slane %v4391_v16, %v3466_v11  ;;  %p4511_p2 = pnand %p4510_p1, %p4504_p12 }
 0x7ad   :  { %3378 = vmatpush1.bf16.msra.mxu1 %v4327_v2  ;;  %v3471_v2 = vrot.slane %v4392_v18, %v3466_v11 }
 0x7ae   :  { %3379 = vmatprep.subr.bf16.mxu1 %v4332_v8 }
 0x7b1   :  { %3380 = vmatpush1.bf16.msra.mxu1 %v4330_v38 }
 0x7b2   :  { %3381 = vmatprep.subr.bf16.mxu1 %v4335_v21 }
 0x7b5   :  { %3382 = vmatpush1.bf16.msra.mxu1 %v4333_v22 }
 0x7b6   :  { %3383 = vmatprep.subr.bf16.mxu1 %v4338_v23 }
 0x7b9   :  { %3384 = vmatpush1.bf16.msra.mxu1 %v4336_v25 }
 0x7ba   :  { %3385 = vmatprep.subr.bf16.mxu1 %v4341_v26 }
 0x7bd   :  { %3386 = vmatpush1.bf16.msra.mxu1 %v4339_v27 }
 0x7be   :  { %3387 = vmatprep.subr.bf16.mxu1 %v4344_v28 }
 0x7c1   :  { %3388 = vmatpush1.bf16.msra.mxu1 %v4342_v29 }
 0x7c2   :  { %3389 = vmatprep.subr.bf16.mxu1 %v4347_v31 }
 0x7c5   :  { %3390 = vmatpush1.bf16.msra.mxu1 %v4345_v33 }
 0x7c6   :  { %3391 = vmatprep.subr.bf16.mxu1 %v4350_v34 }
 0x7c9   :  { %3392 = vmatpush1.bf16.msra.mxu1 %v4348_v35 }
 0x7ca   :  { %3393 = vmatprep.subr.bf16.mxu1 %v4353_v36 }
 0x7cd   :  { %3394 = vmatpush1.bf16.msra.mxu1 %v4351_v37 }
 0x7ce   :  { %3395 = vmatprep.subr.bf16.mxu1 %v4356_v40 }
 0x7d1   :  { %3396 = vmatpush1.bf16.msra.mxu1 %v4354_v41 }
 0x7d2   :  { %3397 = vmatprep.subr.bf16.mxu1 %v4359_v42 }
 0x7d5   :  { %3398 = vmatpush1.bf16.msra.mxu1 %v4357_v44 }
 0x7d6   :  { %3399 = vmatprep.subr.bf16.mxu1 %v4362_v45 }
 0x7d9   :  { %3400 = vmatpush1.bf16.msra.mxu1 %v4360_v46 }
 0x7dc   :  { %3402 = vmatmul.mubr.bf16.vlgmr.msra.gmra.mrb[24].mxu1 %v2470_v32 }
 0x8af   :  { %v3403_v47 = vpop.f32.mrb[24].mxu1 }
 0x8b0   :  { %v3412_v49 = vadd.f32 %v3403_v47, %v4779_v12  ;;  %v3405_v50 = vpop.f32.mrb[25].mxu1 }
 0x8b1   :  { %v3413_v43 = vadd.f32 %v3405_v50, %v4775_v0  ;;  %v3407_v39 = vpop.f32.mrb[26].mxu1 }
 0x8b2   :  { %v3414_v48 = vadd.f32 %v3407_v39, %v4781_v63  ;;  %v3409_v51 = vpop.f32.mrb[27].mxu1  ;;  %v3424_v54 = vmul.f32 %v3412_v49, %v3412_v49 }
 0x8b3   :  { %v3415_v52 = vadd.f32 %v3409_v51, %v4777_v3  ;;  %v3416_v53 = vadd.f32 %v3413_v43, %v3412_v49  ;;  %v3425_v56 = vmul.f32 %v3413_v43, %v3413_v43 }
 0x8b4   :  { %v3426_v6 = vmul.f32 %v3414_v48, %v3414_v48 }
 0x8b5   :  { %3417 = vadd.xlane.f32.xlu0 %v3416_v53  ;;  %v3419_v59 = vadd.f32 %v3415_v52, %v3414_v48  ;;  %v3427_v24 = vmul.f32 %v3415_v52, %v3415_v52  ;;  %v3428_v30 = vadd.f32 %v3425_v56, %v3424_v54 }
 0x8b7   :  { %3420 = vadd.xlane.f32.xlu1 %v3419_v59  ;;  %v3431_v12 = vadd.f32 %v3427_v24, %v3426_v6 }
 0x8b9   :  { %3429 = vadd.xlane.f32.xlu0 %v3428_v30 }
 0x8bb   :  { %3432 = vadd.xlane.f32.xlu1 %v3431_v12 }
 0x942   :  { %v3418_v32 = vpop.xlane.xlu0 %3417 }
 0x943   :  { %v3422_v0 = vmul.f32 0.00390625, %v3418_v32 }
 0x944   :  { %v3421_v60 = vpop.xlane.xlu1 %3420 }
 0x945   :  { %v3423_v10 = vmul.f32 0.00390625, %v3421_v60  ;;  %v3436_v61 = vmul.f32 %v3422_v0, %v3422_v0  ;;  %v3440_v13 = vsub.f32 %v3412_v49, %v3422_v0  ;;  %v3441_v14 = vsub.f32 %v3413_v43, %v3422_v0 }
 0x946   :  { %v3430_v63 = vpop.xlane.xlu0 %3429 }
 0x947   :  { %v3434_v62 = vmul.f32 0.00390625, %v3430_v63  ;;  %v3437_v5 = vmul.f32 %v3423_v10, %v3423_v10  ;;  %v3442_v8 = vsub.f32 %v3414_v48, %v3423_v10  ;;  %v3443_v38 = vsub.f32 %v3415_v52, %v3423_v10 }
 0x948   :  { %v3433_v3 = vpop.xlane.xlu1 %3432 }
 0x949   :  { %v3438_v4 = vsub.f32 %v3434_v62, %v3436_v61  ;;  %v3435_v7 = vmul.f32 0.00390625, %v3433_v3 }
 0x94b   :  { %v3444_v58 = vadd.f32 1e-06, %v3438_v4  ;;  %v3439_v57 = vsub.f32 %v3435_v7, %v3437_v5 }
 0x94d   :  { %4383 = vrsqrt.f32 %v3444_v58  ;;  %v3445_v9 = vadd.f32 1e-06, %v3439_v57 }
 0x94f   :  { %4385 = vrsqrt.f32 %v3445_v9 }
 0x957   :  { %v4384_v19 = vpop.eup %4383 }
 0x958   :  { %v3448_v21 = vmul.f32 %v4384_v19, %v3440_v13  ;;  %v3449_v22 = vmul.f32 %v4384_v19, %v3441_v14 }
 0x959   :  { %v4386_v55 = vpop.eup %4385 }
 0x95a   :  { %v3450_v23 = vmul.f32 %v4386_v55, %v3442_v8  ;;  %v3451_v25 = vmul.f32 %v4386_v55, %v3443_v38  ;;  %v3460_v26 = vmul.f32 %v3455_v17, %v3448_v21  ;;  %v3461_v27 = vmul.f32 %v3459_v15, %v3449_v22 }
 0x95c   :  { %v3462_v28 = vmul.f32 %v3455_v17, %v3450_v23  ;;  %v3463_v29 = vmul.f32 %v3459_v15, %v3451_v25  ;;  %v3472_v31 = vadd.f32 %v3467_v20, %v3460_v26  ;;  %v3473_v33 = vadd.f32 %v3471_v2, %v3461_v27 }
 0x95e   :  { %v3474_v34 = vadd.f32 %v3467_v20, %v3462_v28  ;;  %v3475_v35 = vadd.f32 %v3471_v2, %v3463_v29  ;;  %3476 = vst [vmem:[#allocation11] sm:$0xff] %v3472_v31  ;;  %3477 = vst [vmem:[#allocation11 + $0x8] sm:$0xff] %v3473_v33 }
 0x960   :  { %3478 = vst [vmem:[#allocation11 + $0x10] sm:$0xff] %v3474_v34  ;;  %3479 = vst [vmem:[#allocation11 + $0x18] sm:$0xff] %v3475_v35 }
 0x961   :  { %4514 = shalt.err (!%p4511_p2)
}
 0x962   :  { %s4515_s22 = scalar_lea.hbm %s4862_s6, 512 }
 0x963   :  { %p4516_p3 = scmp.ne.s32.totalorder %s4862_s6, %s4515_s22  ;;  %p4519_p4 = scmp.lt.u32.totalorder %s4515_s22, %s4862_s6 }
 0x965   :  { %p4521_p5 = pnand %p4519_p4, %p4516_p3 }
 0x967   :  { %4524 = shalt.err (!%p4521_p5)
}
 0x968   :  { %3491 = dma.vmem_to_hbm [thread:$0]  %s3486_s1, 512, %s4862_s6, [#allocation4], %s4540_s3, %s4540_s3, %s4541_s10  }
 0x969   :  { %4531 = dma.done.wait [#allocation4], 512  }
 0x96a   :  { %4532 = vsyncadd [#allocation4], 4294966784 }
 0x96b   :  { %3495 = vsyncpa [#allocation3], 1 }
 0x96c   :  { %3496 = vsyncpa [#allocation6], 1 }
 0x96d   :  { %3497 = vsyncpa [#allocation9], 1 }
 0x96e   :  { %3498 = vsyncpa [#allocation4], 1 }

</bundles_post_ra>
